<compile_context>
chip_gen: v7x
topology: tpu7x:2x2x1
jax: 0.10.0
libtpu: 0.0.40
codegen_flags: <defaults>
</compile_context>

<pallas_src>
import jax
import jax.numpy as jnp
from jax.experimental import pallas as pl
from jax.experimental.pallas import tpu as pltpu


# ----------------------------- Pallas kernel --------------------------------
def _gve_kernel(robot_ref, human_ref,
                wr1, br1, wr2, br2,
                wh1, bh1, wh2, bh2,
                wa, wg1, wg2,
                wv1, bv1, wv2, bv2, wv3, bv3, wv4t, bv4,
                out_ref):
    f32 = jnp.float32
    TB = robot_ref.shape[0]            # batch tile
    N, _, dh = human_ref.shape         # humans per sample
    F = wa.shape[0]                    # node feature width (32)
    M = N + 1                          # nodes per sample (robot + humans)

    def dense(x, w_ref, b_ref=None, relu=True):
        y = jnp.dot(x, w_ref[...], preferred_element_type=f32)
        if b_ref is not None:
            y = y + b_ref[...]
        return jnp.maximum(y, 0.0) if relu else y

    # ---- node embedding MLPs: batch folded into the matmul M dimension ----
    r_emb = dense(dense(robot_ref[...], wr1, br1), wr2, br2)            # [TB, F]
    h_flat = human_ref[...].reshape(N * TB, dh)                         # tile-aligned
    h_emb = dense(dense(h_flat, wh1, bh1), wh2, bh2).reshape(N, TB, F)  # [N, TB, F]

    # node-major feature tensor: Xs[m, b, :] = features of node m of sample b
    Xs = jnp.concatenate([r_emb[None], h_emb], axis=0)                  # [M, TB, F]

    # ---- embedded-gaussian similarity + row softmax (per sample) ----
    xwa = jnp.dot(Xs.reshape(M * TB, F), wa[...],
                  preferred_element_type=f32).reshape(M, TB, F)
    # logits[m, b, n] = <xwa[m, b, :], Xs[n, b, :]>  (VPU mult + XLU lane reduce,
    # transpose never materialized, no per-sample MXU matmuls)
    cols = [jnp.sum(xwa * Xs[n][None], axis=-1, keepdims=True)          # [M, TB, 1]
            for n in range(M)]
    mmax = cols[0]
    for c in cols[1:]:
        mmax = jnp.maximum(mmax, c)
    exps = [jnp.exp(c - mmax) for c in cols]
    den = exps[0]
    for e in exps[1:]:
        den = den + e
    inv = pl.reciprocal(den, approx=True)                               # EUP slot
    A_cols = [e * inv for e in exps]    # softmax over the node (n) axis

    # ---- 2 GCN layers with skip connections ----
    def gcn_layer(nodes, wg_ref):
        # aggregation A @ nodes on the VPU, unrolled over the M neighbor columns
        agg = A_cols[0] * nodes[0][None]                                # [M, TB, F]
        for n in range(1, M):
            agg = agg + A_cols[n] * nodes[n][None]
        h = jnp.dot(agg.reshape(M * TB, F), wg_ref[...],
                    preferred_element_type=f32).reshape(M, TB, F)
        return jnp.maximum(h, 0.0) + nodes

    H1 = gcn_layer(Xs, wg1)
    H2 = gcn_layer(H1, wg2)

    # ---- robot node as state representation -> value MLP ----
    s = H2[0]                                                           # [TB, F]
    v = dense(s, wv1, bv1)                                              # [TB, 32]
    v = dense(v, wv2, bv2)                                              # [TB, 128] (padded)
    v = dense(v, wv3, bv3)                                              # [TB, 128] (padded)
    # final layer as (1,H) x (TB,H)^T so the result is lane-major (1, TB)
    out_row = jax.lax.dot_general(
        wv4t[...], v, dimension_numbers=(((1,), (1,)), ((), ())),
        preferred_element_type=f32) + bv4[...]                          # [1, TB]
    out_ref[...] = out_row.reshape(1, 1, TB)


# ------------------------------ wrapper --------------------------------------
def graph_value_estimator(robot_state, human_states, params, *, tb=None):
    """robot_state: [B, 1, dr] f32, human_states: [B, N, dh] f32 -> value [B, 1]."""
    # same asserts as the PyTorch forward
    assert robot_state.ndim == 3 and human_states.ndim == 3

    B, one, dr = robot_state.shape
    B2, N, dh = human_states.shape
    assert one == 1 and B2 == B

    # batch tile: >=8, 128 for production batch sizes
    if tb is None:
        tb = min(128, max(8, int(pl.next_power_of_2(B))))
    G = pl.cdiv(B, tb)
    B_pad = G * tb

    # ---- wrapper-side layout plumbing (outside the kernel) ----
    robot2 = robot_state.reshape(B, dr).astype(jnp.float32)             # [B, dr]
    human_nm = jnp.transpose(human_states, (1, 0, 2)).astype(jnp.float32)  # [N, B, dh]
    if B_pad != B:
        robot2 = jnp.pad(robot2, ((0, B_pad - B), (0, 0)))
        human_nm = jnp.pad(human_nm, ((0, 0), (0, B_pad - B), (0, 0)))

    # zero-pad value-MLP hidden dims (100 -> 128): mathematically exact.
    def pad_to(a, shape):
        return jnp.pad(a, [(0, t - s) for s, t in zip(a.shape, shape)])

    h2 = params["wv2"].shape[1]
    h3 = params["wv3"].shape[1]
    h2p = ((h2 + 127) // 128) * 128
    h3p = ((h3 + 127) // 128) * 128
    wv2p = pad_to(params["wv2"], (params["wv2"].shape[0], h2p))
    bv2p = pad_to(params["bv2"], (1, h2p))
    wv3p = pad_to(params["wv3"], (h2p, h3p))
    bv3p = pad_to(params["bv3"], (1, h3p))
    wv4t = pad_to(params["wv4"], (h3p, 1)).T                            # [1, h3p]

    param_arrays = [
        params["wr1"], params["br1"], params["wr2"], params["br2"],
        params["wh1"], params["bh1"], params["wh2"], params["bh2"],
        params["wa"], params["wg1"], params["wg2"],
        params["wv1"], params["bv1"], wv2p, bv2p, wv3p, bv3p, wv4t, params["bv4"],
    ]

    def full_spec(arr):
        nd = arr.ndim
        return pl.BlockSpec(arr.shape, lambda g, _nd=nd: (0,) * _nd)

    in_specs = [
        pl.BlockSpec((tb, dr), lambda g: (g, 0)),          # robot (batch tiled)
        pl.BlockSpec((N, tb, dh), lambda g: (0, g, 0)),    # humans (node-major)
    ] + [full_spec(p) for p in param_arrays]

    out = pl.pallas_call(
        _gve_kernel,
        out_shape=jax.ShapeDtypeStruct((G, 1, tb), jnp.float32),
        grid=(G,),
        in_specs=in_specs,
        out_specs=pl.BlockSpec((1, 1, tb), lambda g: (g, 0, 0)),  # lane-dense store
        compiler_params=pltpu.CompilerParams(
            dimension_semantics=("parallel",)),
    )(robot2, human_nm, *param_arrays)

    return out.reshape(B_pad)[:B].reshape(B, 1)


# --------------------------- pure-JAX reference -------------------------------
def _reference(robot_state, human_states, p):
    def mlp2(x, w1, b1, w2, b2):
        x = jnp.maximum(x @ w1 + b1, 0.0)
        return jnp.maximum(x @ w2 + b2, 0.0)

    r_emb = mlp2(robot_state, p["wr1"], p["br1"], p["wr2"], p["br2"])
    h_emb = mlp2(human_states, p["wh1"], p["bh1"], p["wh2"], p["bh2"])
    X = jnp.concatenate([r_emb, h_emb], axis=1)                       # [B, M, 32]
    logits = jnp.einsum("bmd,de,bne->bmn", X, p["wa"], X)
    A = jax.nn.softmax(logits, axis=-1)
    H1 = jnp.maximum(jnp.einsum("bmn,bnd,de->bme", A, X, p["wg1"]), 0.0) + X
    H2 = jnp.maximum(jnp.einsum("bmn,bnd,de->bme", A, H1, p["wg2"]), 0.0) + H1
    s = H2[:, 0, :]
    v = jnp.maximum(s @ p["wv1"] + p["bv1"], 0.0)
    v = jnp.maximum(v @ p["wv2"] + p["bv2"], 0.0)
    v = jnp.maximum(v @ p["wv3"] + p["bv3"], 0.0)
    return v @ p["wv4"] + p["bv4"]


# ------------------------------ parameters ------------------------------------
def init_params(key, dr=9, dh=5, emb=64, xdim=32, v1=32, v2=100, v3=100):
    shapes = {
        "wr1": (dr, emb),   "br1": (1, emb),
        "wr2": (emb, xdim), "br2": (1, xdim),
        "wh1": (dh, emb),   "bh1": (1, emb),
        "wh2": (emb, xdim), "bh2": (1, xdim),
        "wa":  (xdim, xdim),
        "wg1": (xdim, xdim),
        "wg2": (xdim, xdim),
        "wv1": (xdim, v1),  "bv1": (1, v1),
        "wv2": (v1, v2),    "bv2": (1, v2),
        "wv3": (v2, v3),    "bv3": (1, v3),
        "wv4": (v3, 1),     "bv4": (1, 1),
    }
    params = {}
    keys = jax.random.split(key, len(shapes))
    for k_, (name, shp) in zip(keys, sorted(shapes.items())):
        params[name] = 0.1 * jax.random.normal(k_, shp, dtype=jnp.float32)
    return params


# --------------------------------- main ---------------------------------------
if __name__ == "__main__":
    key = jax.random.PRNGKey(0)
    k_p, k_r, k_h = jax.random.split(key, 3)

    B, N_HUMANS, DR, DH = 2, 5, 9, 5
    params = init_params(k_p, dr=DR, dh=DH)

    robot_state = jax.random.normal(k_r, (B, 1, DR), dtype=jnp.float32)
    human_states = jax.random.normal(k_h, (B, N_HUMANS, DH), dtype=jnp.float32)

    value = graph_value_estimator(robot_state, human_states, params)
    value = jax.block_until_ready(value)

    ref = _reference(robot_state, human_states, params)
    assert value.shape == (B, 1)
    # approx reciprocal (EUP) in the softmax denominator -> not bit-identical.
    assert jnp.allclose(value, ref, rtol=1e-3, atol=1e-3), (value, ref)

    print("KERNEL_OK")
</pallas_src>

<mosaic_0001>
module attributes {stable_mosaic.version = 11 : i64} {
  func.func @_gve_kernel(%arg0: i32, %arg1: memref<8x9xf32, #tpu.memory_space<vmem>>, %arg2: memref<5x8x5xf32, #tpu.memory_space<vmem>>, %arg3: memref<9x64xf32, #tpu.memory_space<vmem>>, %arg4: memref<1x64xf32, #tpu.memory_space<vmem>>, %arg5: memref<64x32xf32, #tpu.memory_space<vmem>>, %arg6: memref<1x32xf32, #tpu.memory_space<vmem>>, %arg7: memref<5x64xf32, #tpu.memory_space<vmem>>, %arg8: memref<1x64xf32, #tpu.memory_space<vmem>>, %arg9: memref<64x32xf32, #tpu.memory_space<vmem>>, %arg10: memref<1x32xf32, #tpu.memory_space<vmem>>, %arg11: memref<32x32xf32, #tpu.memory_space<vmem>>, %arg12: memref<32x32xf32, #tpu.memory_space<vmem>>, %arg13: memref<32x32xf32, #tpu.memory_space<vmem>>, %arg14: memref<32x32xf32, #tpu.memory_space<vmem>>, %arg15: memref<1x32xf32, #tpu.memory_space<vmem>>, %arg16: memref<32x128xf32, #tpu.memory_space<vmem>>, %arg17: memref<1x128xf32, #tpu.memory_space<vmem>>, %arg18: memref<128x128xf32, #tpu.memory_space<vmem>>, %arg19: memref<1x128xf32, #tpu.memory_space<vmem>>, %arg20: memref<1x128xf32, #tpu.memory_space<vmem>>, %arg21: memref<1x1xf32, #tpu.memory_space<vmem>>, %arg22: memref<1x1x8xf32, #tpu.memory_space<vmem>>) attributes {dimension_semantics = [#tpu.dimension_semantics<parallel>], iteration_bounds = array<i64: 1>, scalar_prefetch = 0 : i64, scratch_operands = 0 : i64, tpu.core_type = #tpu.core_type<tc>, window_params = [{transform_indices = @transform_0, window_bounds = array<i64: 8, 9>}, {transform_indices = @transform_1, window_bounds = array<i64: 5, 8, 5>}, {pipeline_mode = #tpu.pipeline_mode<synchronous>, transform_indices = @transform_2, window_bounds = array<i64: 9, 64>}, {pipeline_mode = #tpu.pipeline_mode<synchronous>, transform_indices = @transform_3, window_bounds = array<i64: 1, 64>}, {pipeline_mode = #tpu.pipeline_mode<synchronous>, transform_indices = @transform_4, window_bounds = array<i64: 64, 32>}, {pipeline_mode = #tpu.pipeline_mode<synchronous>, transform_indices = @transform_5, window_bounds = array<i64: 1, 32>}, {pipeline_mode = #tpu.pipeline_mode<synchronous>, transform_indices = @transform_6, window_bounds = array<i64: 5, 64>}, {pipeline_mode = #tpu.pipeline_mode<synchronous>, transform_indices = @transform_7, window_bounds = array<i64: 1, 64>}, {pipeline_mode = #tpu.pipeline_mode<synchronous>, transform_indices = @transform_8, window_bounds = array<i64: 64, 32>}, {pipeline_mode = #tpu.pipeline_mode<synchronous>, transform_indices = @transform_9, window_bounds = array<i64: 1, 32>}, {pipeline_mode = #tpu.pipeline_mode<synchronous>, transform_indices = @transform_10, window_bounds = array<i64: 32, 32>}, {pipeline_mode = #tpu.pipeline_mode<synchronous>, transform_indices = @transform_11, window_bounds = array<i64: 32, 32>}, {pipeline_mode = #tpu.pipeline_mode<synchronous>, transform_indices = @transform_12, window_bounds = array<i64: 32, 32>}, {pipeline_mode = #tpu.pipeline_mode<synchronous>, transform_indices = @transform_13, window_bounds = array<i64: 32, 32>}, {pipeline_mode = #tpu.pipeline_mode<synchronous>, transform_indices = @transform_14, window_bounds = array<i64: 1, 32>}, {pipeline_mode = #tpu.pipeline_mode<synchronous>, transform_indices = @transform_15, window_bounds = array<i64: 32, 128>}, {pipeline_mode = #tpu.pipeline_mode<synchronous>, transform_indices = @transform_16, window_bounds = array<i64: 1, 128>}, {pipeline_mode = #tpu.pipeline_mode<synchronous>, transform_indices = @transform_17, window_bounds = array<i64: 128, 128>}, {pipeline_mode = #tpu.pipeline_mode<synchronous>, transform_indices = @transform_18, window_bounds = array<i64: 1, 128>}, {pipeline_mode = #tpu.pipeline_mode<synchronous>, transform_indices = @transform_19, window_bounds = array<i64: 1, 128>}, {pipeline_mode = #tpu.pipeline_mode<synchronous>, transform_indices = @transform_20, window_bounds = array<i64: 1, 1>}, {transform_indices = @transform_21, window_bounds = array<i64: 1, 1, 8>}]} {
    %c0 = arith.constant 0 : index
    %c0_0 = arith.constant 0 : index
    %0 = vector.load %arg1[%c0, %c0_0] : memref<8x9xf32, #tpu.memory_space<vmem>>, vector<8x9xf32>
    %c0_1 = arith.constant 0 : index
    %c0_2 = arith.constant 0 : index
    %1 = vector.load %arg3[%c0_1, %c0_2] : memref<9x64xf32, #tpu.memory_space<vmem>>, vector<9x64xf32>
    %cst = arith.constant dense<0.000000e+00> : vector<8x64xf32>
    %2 = tpu.matmul %0, %1, %cst {dimension_numbers = #tpu.dot_dimension_numbers<[1], [0], [0], [1], [0, 0, 1, 1], [], []>} : vector<8x9xf32>, vector<9x64xf32>, vector<8x64xf32> -> vector<8x64xf32>
    %c0_3 = arith.constant 0 : index
    %c0_4 = arith.constant 0 : index
    %3 = vector.load %arg4[%c0_3, %c0_4] : memref<1x64xf32, #tpu.memory_space<vmem>>, vector<1x64xf32>
    %4 = vector.broadcast %3 : vector<1x64xf32> to vector<8x64xf32>
    %5 = arith.addf %2, %4 : vector<8x64xf32>
    %cst_5 = arith.constant 0.000000e+00 : f32
    %6 = vector.broadcast %cst_5 : f32 to vector<8x64xf32>
    %7 = arith.maximumf %5, %6 : vector<8x64xf32>
    %c0_6 = arith.constant 0 : index
    %c0_7 = arith.constant 0 : index
    %8 = vector.load %arg5[%c0_6, %c0_7] : memref<64x32xf32, #tpu.memory_space<vmem>>, vector<64x32xf32>
    %cst_8 = arith.constant dense<0.000000e+00> : vector<8x32xf32>
    %9 = tpu.matmul %7, %8, %cst_8 {dimension_numbers = #tpu.dot_dimension_numbers<[1], [0], [0], [1], [0, 0, 1, 1], [], []>} : vector<8x64xf32>, vector<64x32xf32>, vector<8x32xf32> -> vector<8x32xf32>
    %c0_9 = arith.constant 0 : index
    %c0_10 = arith.constant 0 : index
    %10 = vector.load %arg6[%c0_9, %c0_10] : memref<1x32xf32, #tpu.memory_space<vmem>>, vector<1x32xf32>
    %11 = vector.broadcast %10 : vector<1x32xf32> to vector<8x32xf32>
    %12 = arith.addf %9, %11 : vector<8x32xf32>
    %cst_11 = arith.constant 0.000000e+00 : f32
    %13 = vector.broadcast %cst_11 : f32 to vector<8x32xf32>
    %14 = arith.maximumf %12, %13 : vector<8x32xf32>
    %c0_12 = arith.constant 0 : index
    %c0_13 = arith.constant 0 : index
    %c0_14 = arith.constant 0 : index
    %15 = vector.load %arg2[%c0_12, %c0_13, %c0_14] : memref<5x8x5xf32, #tpu.memory_space<vmem>>, vector<5x8x5xf32>
    %16 = vector.shape_cast %15 : vector<5x8x5xf32> to vector<40x5xf32>
    %c0_15 = arith.constant 0 : index
    %c0_16 = arith.constant 0 : index
    %17 = vector.load %arg7[%c0_15, %c0_16] : memref<5x64xf32, #tpu.memory_space<vmem>>, vector<5x64xf32>
    %cst_17 = arith.constant dense<0.000000e+00> : vector<40x64xf32>
    %18 = tpu.matmul %16, %17, %cst_17 {dimension_numbers = #tpu.dot_dimension_numbers<[1], [0], [0], [1], [0, 0, 1, 1], [], []>} : vector<40x5xf32>, vector<5x64xf32>, vector<40x64xf32> -> vector<40x64xf32>
    %c0_18 = arith.constant 0 : index
    %c0_19 = arith.constant 0 : index
    %19 = vector.load %arg8[%c0_18, %c0_19] : memref<1x64xf32, #tpu.memory_space<vmem>>, vector<1x64xf32>
    %20 = vector.broadcast %19 : vector<1x64xf32> to vector<40x64xf32>
    %21 = arith.addf %18, %20 : vector<40x64xf32>
    %cst_20 = arith.constant 0.000000e+00 : f32
    %22 = vector.broadcast %cst_20 : f32 to vector<40x64xf32>
    %23 = arith.maximumf %21, %22 : vector<40x64xf32>
    %c0_21 = arith.constant 0 : index
    %c0_22 = arith.constant 0 : index
    %24 = vector.load %arg9[%c0_21, %c0_22] : memref<64x32xf32, #tpu.memory_space<vmem>>, vector<64x32xf32>
    %cst_23 = arith.constant dense<0.000000e+00> : vector<40x32xf32>
    %25 = tpu.matmul %23, %24, %cst_23 {dimension_numbers = #tpu.dot_dimension_numbers<[1], [0], [0], [1], [0, 0, 1, 1], [], []>} : vector<40x64xf32>, vector<64x32xf32>, vector<40x32xf32> -> vector<40x32xf32>
    %c0_24 = arith.constant 0 : index
    %c0_25 = arith.constant 0 : index
    %26 = vector.load %arg10[%c0_24, %c0_25] : memref<1x32xf32, #tpu.memory_space<vmem>>, vector<1x32xf32>
    %27 = vector.broadcast %26 : vector<1x32xf32> to vector<40x32xf32>
    %28 = arith.addf %25, %27 : vector<40x32xf32>
    %cst_26 = arith.constant 0.000000e+00 : f32
    %29 = vector.broadcast %cst_26 : f32 to vector<40x32xf32>
    %30 = arith.maximumf %28, %29 : vector<40x32xf32>
    %31 = vector.shape_cast %30 : vector<40x32xf32> to vector<5x8x32xf32>
    %32 = vector.shape_cast %14 : vector<8x32xf32> to vector<1x8x32xf32>
    %33 = tpu.concatenate %32, %31 in 0 : vector<1x8x32xf32>, vector<5x8x32xf32> -> vector<6x8x32xf32>
    %34 = vector.shape_cast %33 : vector<6x8x32xf32> to vector<48x32xf32>
    %c0_27 = arith.constant 0 : index
    %c0_28 = arith.constant 0 : index
    %35 = vector.load %arg11[%c0_27, %c0_28] : memref<32x32xf32, #tpu.memory_space<vmem>>, vector<32x32xf32>
    %cst_29 = arith.constant dense<0.000000e+00> : vector<48x32xf32>
    %36 = tpu.matmul %34, %35, %cst_29 {dimension_numbers = #tpu.dot_dimension_numbers<[1], [0], [0], [1], [0, 0, 1, 1], [], []>} : vector<48x32xf32>, vector<32x32xf32>, vector<48x32xf32> -> vector<48x32xf32>
    %37 = vector.shape_cast %36 : vector<48x32xf32> to vector<6x8x32xf32>
    %38 = vector.extract_strided_slice %33 {offsets = [0, 0, 0], sizes = [1, 8, 32], strides = [1, 1, 1]} : vector<6x8x32xf32> to vector<1x8x32xf32>
    %39 = vector.shape_cast %38 : vector<1x8x32xf32> to vector<8x32xf32>
    %40 = vector.shape_cast %39 : vector<8x32xf32> to vector<1x8x32xf32>
    %41 = vector.broadcast %40 : vector<1x8x32xf32> to vector<6x8x32xf32>
    %42 = arith.mulf %37, %41 : vector<6x8x32xf32>
    %cst_30 = arith.constant dense<0.000000e+00> : vector<6x8xf32>
    %43 = vector.multi_reduction <add>, %42, %cst_30 [2] : vector<6x8x32xf32> to vector<6x8xf32>
    %44 = vector.shape_cast %43 : vector<6x8xf32> to vector<6x8x1xf32>
    %45 = vector.extract_strided_slice %33 {offsets = [1, 0, 0], sizes = [1, 8, 32], strides = [1, 1, 1]} : vector<6x8x32xf32> to vector<1x8x32xf32>
    %46 = vector.shape_cast %45 : vector<1x8x32xf32> to vector<8x32xf32>
    %47 = vector.shape_cast %46 : vector<8x32xf32> to vector<1x8x32xf32>
    %48 = vector.broadcast %47 : vector<1x8x32xf32> to vector<6x8x32xf32>
    %49 = arith.mulf %37, %48 : vector<6x8x32xf32>
    %cst_31 = arith.constant dense<0.000000e+00> : vector<6x8xf32>
    %50 = vector.multi_reduction <add>, %49, %cst_31 [2] : vector<6x8x32xf32> to vector<6x8xf32>
    %51 = vector.shape_cast %50 : vector<6x8xf32> to vector<6x8x1xf32>
    %52 = vector.extract_strided_slice %33 {offsets = [2, 0, 0], sizes = [1, 8, 32], strides = [1, 1, 1]} : vector<6x8x32xf32> to vector<1x8x32xf32>
    %53 = vector.shape_cast %52 : vector<1x8x32xf32> to vector<8x32xf32>
    %54 = vector.shape_cast %53 : vector<8x32xf32> to vector<1x8x32xf32>
    %55 = vector.broadcast %54 : vector<1x8x32xf32> to vector<6x8x32xf32>
    %56 = arith.mulf %37, %55 : vector<6x8x32xf32>
    %cst_32 = arith.constant dense<0.000000e+00> : vector<6x8xf32>
    %57 = vector.multi_reduction <add>, %56, %cst_32 [2] : vector<6x8x32xf32> to vector<6x8xf32>
    %58 = vector.shape_cast %57 : vector<6x8xf32> to vector<6x8x1xf32>
    %59 = vector.extract_strided_slice %33 {offsets = [3, 0, 0], sizes = [1, 8, 32], strides = [1, 1, 1]} : vector<6x8x32xf32> to vector<1x8x32xf32>
    %60 = vector.shape_cast %59 : vector<1x8x32xf32> to vector<8x32xf32>
    %61 = vector.shape_cast %60 : vector<8x32xf32> to vector<1x8x32xf32>
    %62 = vector.broadcast %61 : vector<1x8x32xf32> to vector<6x8x32xf32>
    %63 = arith.mulf %37, %62 : vector<6x8x32xf32>
    %cst_33 = arith.constant dense<0.000000e+00> : vector<6x8xf32>
    %64 = vector.multi_reduction <add>, %63, %cst_33 [2] : vector<6x8x32xf32> to vector<6x8xf32>
    %65 = vector.shape_cast %64 : vector<6x8xf32> to vector<6x8x1xf32>
    %66 = vector.extract_strided_slice %33 {offsets = [4, 0, 0], sizes = [1, 8, 32], strides = [1, 1, 1]} : vector<6x8x32xf32> to vector<1x8x32xf32>
    %67 = vector.shape_cast %66 : vector<1x8x32xf32> to vector<8x32xf32>
    %68 = vector.shape_cast %67 : vector<8x32xf32> to vector<1x8x32xf32>
    %69 = vector.broadcast %68 : vector<1x8x32xf32> to vector<6x8x32xf32>
    %70 = arith.mulf %37, %69 : vector<6x8x32xf32>
    %cst_34 = arith.constant dense<0.000000e+00> : vector<6x8xf32>
    %71 = vector.multi_reduction <add>, %70, %cst_34 [2] : vector<6x8x32xf32> to vector<6x8xf32>
    %72 = vector.shape_cast %71 : vector<6x8xf32> to vector<6x8x1xf32>
    %73 = vector.extract_strided_slice %33 {offsets = [5, 0, 0], sizes = [1, 8, 32], strides = [1, 1, 1]} : vector<6x8x32xf32> to vector<1x8x32xf32>
    %74 = vector.shape_cast %73 : vector<1x8x32xf32> to vector<8x32xf32>
    %75 = vector.shape_cast %74 : vector<8x32xf32> to vector<1x8x32xf32>
    %76 = vector.broadcast %75 : vector<1x8x32xf32> to vector<6x8x32xf32>
    %77 = arith.mulf %37, %76 : vector<6x8x32xf32>
    %cst_35 = arith.constant dense<0.000000e+00> : vector<6x8xf32>
    %78 = vector.multi_reduction <add>, %77, %cst_35 [2] : vector<6x8x32xf32> to vector<6x8xf32>
    %79 = vector.shape_cast %78 : vector<6x8xf32> to vector<6x8x1xf32>
    %80 = arith.maximumf %44, %51 : vector<6x8x1xf32>
    %81 = arith.maximumf %80, %58 : vector<6x8x1xf32>
    %82 = arith.maximumf %81, %65 : vector<6x8x1xf32>
    %83 = arith.maximumf %82, %72 : vector<6x8x1xf32>
    %84 = arith.maximumf %83, %79 : vector<6x8x1xf32>
    %85 = arith.subf %44, %84 : vector<6x8x1xf32>
    %86 = math.exp %85 : vector<6x8x1xf32>
    %87 = arith.subf %51, %84 : vector<6x8x1xf32>
    %88 = math.exp %87 : vector<6x8x1xf32>
    %89 = arith.subf %58, %84 : vector<6x8x1xf32>
    %90 = math.exp %89 : vector<6x8x1xf32>
    %91 = arith.subf %65, %84 : vector<6x8x1xf32>
    %92 = math.exp %91 : vector<6x8x1xf32>
    %93 = arith.subf %72, %84 : vector<6x8x1xf32>
    %94 = math.exp %93 : vector<6x8x1xf32>
    %95 = arith.subf %79, %84 : vector<6x8x1xf32>
    %96 = math.exp %95 : vector<6x8x1xf32>
    %97 = arith.addf %86, %88 : vector<6x8x1xf32>
    %98 = arith.addf %97, %90 : vector<6x8x1xf32>
    %99 = arith.addf %98, %92 : vector<6x8x1xf32>
    %100 = arith.addf %99, %94 : vector<6x8x1xf32>
    %101 = arith.addf %100, %96 : vector<6x8x1xf32>
    %102 = tpu.reciprocal %101 {approx = true} : vector<6x8x1xf32> -> vector<6x8x1xf32>
    %103 = arith.mulf %86, %102 : vector<6x8x1xf32>
    %104 = arith.mulf %88, %102 : vector<6x8x1xf32>
    %105 = arith.mulf %90, %102 : vector<6x8x1xf32>
    %106 = arith.mulf %92, %102 : vector<6x8x1xf32>
    %107 = arith.mulf %94, %102 : vector<6x8x1xf32>
    %108 = arith.mulf %96, %102 : vector<6x8x1xf32>
    %109 = vector.extract_strided_slice %33 {offsets = [0, 0, 0], sizes = [1, 8, 32], strides = [1, 1, 1]} : vector<6x8x32xf32> to vector<1x8x32xf32>
    %110 = vector.shape_cast %109 : vector<1x8x32xf32> to vector<8x32xf32>
    %111 = vector.shape_cast %110 : vector<8x32xf32> to vector<1x8x32xf32>
    %112 = vector.broadcast %103 : vector<6x8x1xf32> to vector<6x8x32xf32>
    %113 = vector.broadcast %111 : vector<1x8x32xf32> to vector<6x8x32xf32>
    %114 = arith.mulf %112, %113 : vector<6x8x32xf32>
    %115 = vector.extract_strided_slice %33 {offsets = [1, 0, 0], sizes = [1, 8, 32], strides = [1, 1, 1]} : vector<6x8x32xf32> to vector<1x8x32xf32>
    %116 = vector.shape_cast %115 : vector<1x8x32xf32> to vector<8x32xf32>
    %117 = vector.shape_cast %116 : vector<8x32xf32> to vector<1x8x32xf32>
    %118 = vector.broadcast %104 : vector<6x8x1xf32> to vector<6x8x32xf32>
    %119 = vector.broadcast %117 : vector<1x8x32xf32> to vector<6x8x32xf32>
    %120 = arith.mulf %118, %119 : vector<6x8x32xf32>
    %121 = arith.addf %114, %120 : vector<6x8x32xf32>
    %122 = vector.extract_strided_slice %33 {offsets = [2, 0, 0], sizes = [1, 8, 32], strides = [1, 1, 1]} : vector<6x8x32xf32> to vector<1x8x32xf32>
    %123 = vector.shape_cast %122 : vector<1x8x32xf32> to vector<8x32xf32>
    %124 = vector.shape_cast %123 : vector<8x32xf32> to vector<1x8x32xf32>
    %125 = vector.broadcast %105 : vector<6x8x1xf32> to vector<6x8x32xf32>
    %126 = vector.broadcast %124 : vector<1x8x32xf32> to vector<6x8x32xf32>
    %127 = arith.mulf %125, %126 : vector<6x8x32xf32>
    %128 = arith.addf %121, %127 : vector<6x8x32xf32>
    %129 = vector.extract_strided_slice %33 {offsets = [3, 0, 0], sizes = [1, 8, 32], strides = [1, 1, 1]} : vector<6x8x32xf32> to vector<1x8x32xf32>
    %130 = vector.shape_cast %129 : vector<1x8x32xf32> to vector<8x32xf32>
    %131 = vector.shape_cast %130 : vector<8x32xf32> to vector<1x8x32xf32>
    %132 = vector.broadcast %106 : vector<6x8x1xf32> to vector<6x8x32xf32>
    %133 = vector.broadcast %131 : vector<1x8x32xf32> to vector<6x8x32xf32>
    %134 = arith.mulf %132, %133 : vector<6x8x32xf32>
    %135 = arith.addf %128, %134 : vector<6x8x32xf32>
    %136 = vector.extract_strided_slice %33 {offsets = [4, 0, 0], sizes = [1, 8, 32], strides = [1, 1, 1]} : vector<6x8x32xf32> to vector<1x8x32xf32>
    %137 = vector.shape_cast %136 : vector<1x8x32xf32> to vector<8x32xf32>
    %138 = vector.shape_cast %137 : vector<8x32xf32> to vector<1x8x32xf32>
    %139 = vector.broadcast %107 : vector<6x8x1xf32> to vector<6x8x32xf32>
    %140 = vector.broadcast %138 : vector<1x8x32xf32> to vector<6x8x32xf32>
    %141 = arith.mulf %139, %140 : vector<6x8x32xf32>
    %142 = arith.addf %135, %141 : vector<6x8x32xf32>
    %143 = vector.extract_strided_slice %33 {offsets = [5, 0, 0], sizes = [1, 8, 32], strides = [1, 1, 1]} : vector<6x8x32xf32> to vector<1x8x32xf32>
    %144 = vector.shape_cast %143 : vector<1x8x32xf32> to vector<8x32xf32>
    %145 = vector.shape_cast %144 : vector<8x32xf32> to vector<1x8x32xf32>
    %146 = vector.broadcast %108 : vector<6x8x1xf32> to vector<6x8x32xf32>
    %147 = vector.broadcast %145 : vector<1x8x32xf32> to vector<6x8x32xf32>
    %148 = arith.mulf %146, %147 : vector<6x8x32xf32>
    %149 = arith.addf %142, %148 : vector<6x8x32xf32>
    %150 = vector.shape_cast %149 : vector<6x8x32xf32> to vector<48x32xf32>
    %c0_36 = arith.constant 0 : index
    %c0_37 = arith.constant 0 : index
    %151 = vector.load %arg12[%c0_36, %c0_37] : memref<32x32xf32, #tpu.memory_space<vmem>>, vector<32x32xf32>
    %cst_38 = arith.constant dense<0.000000e+00> : vector<48x32xf32>
    %152 = tpu.matmul %150, %151, %cst_38 {dimension_numbers = #tpu.dot_dimension_numbers<[1], [0], [0], [1], [0, 0, 1, 1], [], []>} : vector<48x32xf32>, vector<32x32xf32>, vector<48x32xf32> -> vector<48x32xf32>
    %153 = vector.shape_cast %152 : vector<48x32xf32> to vector<6x8x32xf32>
    %cst_39 = arith.constant 0.000000e+00 : f32
    %154 = vector.broadcast %cst_39 : f32 to vector<6x8x32xf32>
    %155 = arith.maximumf %153, %154 : vector<6x8x32xf32>
    %156 = arith.addf %155, %33 : vector<6x8x32xf32>
    %157 = vector.extract_strided_slice %156 {offsets = [0, 0, 0], sizes = [1, 8, 32], strides = [1, 1, 1]} : vector<6x8x32xf32> to vector<1x8x32xf32>
    %158 = vector.shape_cast %157 : vector<1x8x32xf32> to vector<8x32xf32>
    %159 = vector.shape_cast %158 : vector<8x32xf32> to vector<1x8x32xf32>
    %160 = vector.broadcast %103 : vector<6x8x1xf32> to vector<6x8x32xf32>
    %161 = vector.broadcast %159 : vector<1x8x32xf32> to vector<6x8x32xf32>
    %162 = arith.mulf %160, %161 : vector<6x8x32xf32>
    %163 = vector.extract_strided_slice %156 {offsets = [1, 0, 0], sizes = [1, 8, 32], strides = [1, 1, 1]} : vector<6x8x32xf32> to vector<1x8x32xf32>
    %164 = vector.shape_cast %163 : vector<1x8x32xf32> to vector<8x32xf32>
    %165 = vector.shape_cast %164 : vector<8x32xf32> to vector<1x8x32xf32>
    %166 = vector.broadcast %104 : vector<6x8x1xf32> to vector<6x8x32xf32>
    %167 = vector.broadcast %165 : vector<1x8x32xf32> to vector<6x8x32xf32>
    %168 = arith.mulf %166, %167 : vector<6x8x32xf32>
    %169 = arith.addf %162, %168 : vector<6x8x32xf32>
    %170 = vector.extract_strided_slice %156 {offsets = [2, 0, 0], sizes = [1, 8, 32], strides = [1, 1, 1]} : vector<6x8x32xf32> to vector<1x8x32xf32>
    %171 = vector.shape_cast %170 : vector<1x8x32xf32> to vector<8x32xf32>
    %172 = vector.shape_cast %171 : vector<8x32xf32> to vector<1x8x32xf32>
    %173 = vector.broadcast %105 : vector<6x8x1xf32> to vector<6x8x32xf32>
    %174 = vector.broadcast %172 : vector<1x8x32xf32> to vector<6x8x32xf32>
    %175 = arith.mulf %173, %174 : vector<6x8x32xf32>
    %176 = arith.addf %169, %175 : vector<6x8x32xf32>
    %177 = vector.extract_strided_slice %156 {offsets = [3, 0, 0], sizes = [1, 8, 32], strides = [1, 1, 1]} : vector<6x8x32xf32> to vector<1x8x32xf32>
    %178 = vector.shape_cast %177 : vector<1x8x32xf32> to vector<8x32xf32>
    %179 = vector.shape_cast %178 : vector<8x32xf32> to vector<1x8x32xf32>
    %180 = vector.broadcast %106 : vector<6x8x1xf32> to vector<6x8x32xf32>
    %181 = vector.broadcast %179 : vector<1x8x32xf32> to vector<6x8x32xf32>
    %182 = arith.mulf %180, %181 : vector<6x8x32xf32>
    %183 = arith.addf %176, %182 : vector<6x8x32xf32>
    %184 = vector.extract_strided_slice %156 {offsets = [4, 0, 0], sizes = [1, 8, 32], strides = [1, 1, 1]} : vector<6x8x32xf32> to vector<1x8x32xf32>
    %185 = vector.shape_cast %184 : vector<1x8x32xf32> to vector<8x32xf32>
    %186 = vector.shape_cast %185 : vector<8x32xf32> to vector<1x8x32xf32>
    %187 = vector.broadcast %107 : vector<6x8x1xf32> to vector<6x8x32xf32>
    %188 = vector.broadcast %186 : vector<1x8x32xf32> to vector<6x8x32xf32>
    %189 = arith.mulf %187, %188 : vector<6x8x32xf32>
    %190 = arith.addf %183, %189 : vector<6x8x32xf32>
    %191 = vector.extract_strided_slice %156 {offsets = [5, 0, 0], sizes = [1, 8, 32], strides = [1, 1, 1]} : vector<6x8x32xf32> to vector<1x8x32xf32>
    %192 = vector.shape_cast %191 : vector<1x8x32xf32> to vector<8x32xf32>
    %193 = vector.shape_cast %192 : vector<8x32xf32> to vector<1x8x32xf32>
    %194 = vector.broadcast %108 : vector<6x8x1xf32> to vector<6x8x32xf32>
    %195 = vector.broadcast %193 : vector<1x8x32xf32> to vector<6x8x32xf32>
    %196 = arith.mulf %194, %195 : vector<6x8x32xf32>
    %197 = arith.addf %190, %196 : vector<6x8x32xf32>
    %198 = vector.shape_cast %197 : vector<6x8x32xf32> to vector<48x32xf32>
    %c0_40 = arith.constant 0 : index
    %c0_41 = arith.constant 0 : index
    %199 = vector.load %arg13[%c0_40, %c0_41] : memref<32x32xf32, #tpu.memory_space<vmem>>, vector<32x32xf32>
    %cst_42 = arith.constant dense<0.000000e+00> : vector<48x32xf32>
    %200 = tpu.matmul %198, %199, %cst_42 {dimension_numbers = #tpu.dot_dimension_numbers<[1], [0], [0], [1], [0, 0, 1, 1], [], []>} : vector<48x32xf32>, vector<32x32xf32>, vector<48x32xf32> -> vector<48x32xf32>
    %201 = vector.shape_cast %200 : vector<48x32xf32> to vector<6x8x32xf32>
    %cst_43 = arith.constant 0.000000e+00 : f32
    %202 = vector.broadcast %cst_43 : f32 to vector<6x8x32xf32>
    %203 = arith.maximumf %201, %202 : vector<6x8x32xf32>
    %204 = arith.addf %203, %156 : vector<6x8x32xf32>
    %205 = vector.extract_strided_slice %204 {offsets = [0, 0, 0], sizes = [1, 8, 32], strides = [1, 1, 1]} : vector<6x8x32xf32> to vector<1x8x32xf32>
    %206 = vector.shape_cast %205 : vector<1x8x32xf32> to vector<8x32xf32>
    %c0_44 = arith.constant 0 : index
    %c0_45 = arith.constant 0 : index
    %207 = vector.load %arg14[%c0_44, %c0_45] : memref<32x32xf32, #tpu.memory_space<vmem>>, vector<32x32xf32>
    %cst_46 = arith.constant dense<0.000000e+00> : vector<8x32xf32>
    %208 = tpu.matmul %206, %207, %cst_46 {dimension_numbers = #tpu.dot_dimension_numbers<[1], [0], [0], [1], [0, 0, 1, 1], [], []>} : vector<8x32xf32>, vector<32x32xf32>, vector<8x32xf32> -> vector<8x32xf32>
    %c0_47 = arith.constant 0 : index
    %c0_48 = arith.constant 0 : index
    %209 = vector.load %arg15[%c0_47, %c0_48] : memref<1x32xf32, #tpu.memory_space<vmem>>, vector<1x32xf32>
    %210 = vector.broadcast %209 : vector<1x32xf32> to vector<8x32xf32>
    %211 = arith.addf %208, %210 : vector<8x32xf32>
    %cst_49 = arith.constant 0.000000e+00 : f32
    %212 = vector.broadcast %cst_49 : f32 to vector<8x32xf32>
    %213 = arith.maximumf %211, %212 : vector<8x32xf32>
    %c0_50 = arith.constant 0 : index
    %c0_51 = arith.constant 0 : index
    %214 = vector.load %arg16[%c0_50, %c0_51] : memref<32x128xf32, #tpu.memory_space<vmem>>, vector<32x128xf32>
    %cst_52 = arith.constant dense<0.000000e+00> : vector<8x128xf32>
    %215 = tpu.matmul %213, %214, %cst_52 {dimension_numbers = #tpu.dot_dimension_numbers<[1], [0], [0], [1], [0, 0, 1, 1], [], []>} : vector<8x32xf32>, vector<32x128xf32>, vector<8x128xf32> -> vector<8x128xf32>
    %c0_53 = arith.constant 0 : index
    %c0_54 = arith.constant 0 : index
    %216 = vector.load %arg17[%c0_53, %c0_54] : memref<1x128xf32, #tpu.memory_space<vmem>>, vector<1x128xf32>
    %217 = vector.broadcast %216 : vector<1x128xf32> to vector<8x128xf32>
    %218 = arith.addf %215, %217 : vector<8x128xf32>
    %cst_55 = arith.constant 0.000000e+00 : f32
    %219 = vector.broadcast %cst_55 : f32 to vector<8x128xf32>
    %220 = arith.maximumf %218, %219 : vector<8x128xf32>
    %c0_56 = arith.constant 0 : index
    %c0_57 = arith.constant 0 : index
    %221 = vector.load %arg18[%c0_56, %c0_57] : memref<128x128xf32, #tpu.memory_space<vmem>>, vector<128x128xf32>
    %cst_58 = arith.constant dense<0.000000e+00> : vector<8x128xf32>
    %222 = tpu.matmul %220, %221, %cst_58 {dimension_numbers = #tpu.dot_dimension_numbers<[1], [0], [0], [1], [0, 0, 1, 1], [], []>} : vector<8x128xf32>, vector<128x128xf32>, vector<8x128xf32> -> vector<8x128xf32>
    %c0_59 = arith.constant 0 : index
    %c0_60 = arith.constant 0 : index
    %223 = vector.load %arg19[%c0_59, %c0_60] : memref<1x128xf32, #tpu.memory_space<vmem>>, vector<1x128xf32>
    %224 = vector.broadcast %223 : vector<1x128xf32> to vector<8x128xf32>
    %225 = arith.addf %222, %224 : vector<8x128xf32>
    %cst_61 = arith.constant 0.000000e+00 : f32
    %226 = vector.broadcast %cst_61 : f32 to vector<8x128xf32>
    %227 = arith.maximumf %225, %226 : vector<8x128xf32>
    %c0_62 = arith.constant 0 : index
    %c0_63 = arith.constant 0 : index
    %228 = vector.load %arg20[%c0_62, %c0_63] : memref<1x128xf32, #tpu.memory_space<vmem>>, vector<1x128xf32>
    %cst_64 = arith.constant dense<0.000000e+00> : vector<1x8xf32>
    %229 = tpu.matmul %228, %227, %cst_64 {dimension_numbers = #tpu.dot_dimension_numbers<[1], [1], [0], [0], [0, 0, 1, 0], [], []>} : vector<1x128xf32>, vector<8x128xf32>, vector<1x8xf32> -> vector<1x8xf32>
    %c0_65 = arith.constant 0 : index
    %c0_66 = arith.constant 0 : index
    %230 = vector.load %arg21[%c0_65, %c0_66] : memref<1x1xf32, #tpu.memory_space<vmem>>, vector<1x1xf32>
    %231 = vector.broadcast %230 : vector<1x1xf32> to vector<1x8xf32>
    %232 = arith.addf %229, %231 : vector<1x8xf32>
    %233 = vector.shape_cast %232 : vector<1x8xf32> to vector<1x1x8xf32>
    %c0_67 = arith.constant 0 : index
    %c0_68 = arith.constant 0 : index
    %c0_69 = arith.constant 0 : index
    %234 = vector.load %arg22[%c0_67, %c0_68, %c0_69] : memref<1x1x8xf32, #tpu.memory_space<vmem>>, vector<1x1x8xf32>
    tpu.vector_store %arg22[%c0_67, %c0_68, %c0_69], %233 {strides = array<i32>} : memref<1x1x8xf32, #tpu.memory_space<vmem>>, vector<1x1x8xf32>,
    return
  }
  func.func @transform_0(%arg0: i32) -> (i32, i32) {
    %c0_i32 = arith.constant 0 : i32
    %c0_i32_0 = arith.constant 0 : i32
    return %arg0, %c0_i32 : i32, i32
  }
  func.func @transform_1(%arg0: i32) -> (i32, i32, i32) {
    %c0_i32 = arith.constant 0 : i32
    %c0_i32_0 = arith.constant 0 : i32
    %c0_i32_1 = arith.constant 0 : i32
    return %c0_i32, %arg0, %c0_i32_0 : i32, i32, i32
  }
  func.func @transform_2(%arg0: i32) -> (i32, i32) {
    %c0_i32 = arith.constant 0 : i32
    %c0_i32_0 = arith.constant 0 : i32
    %c0_i32_1 = arith.constant 0 : i32
    return %c0_i32, %c0_i32_0 : i32, i32
  }
  func.func @transform_3(%arg0: i32) -> (i32, i32) {
    %c0_i32 = arith.constant 0 : i32
    %c0_i32_0 = arith.constant 0 : i32
    %c0_i32_1 = arith.constant 0 : i32
    return %c0_i32, %c0_i32_0 : i32, i32
  }
  func.func @transform_4(%arg0: i32) -> (i32, i32) {
    %c0_i32 = arith.constant 0 : i32
    %c0_i32_0 = arith.constant 0 : i32
    %c0_i32_1 = arith.constant 0 : i32
    return %c0_i32, %c0_i32_0 : i32, i32
  }
  func.func @transform_5(%arg0: i32) -> (i32, i32) {
    %c0_i32 = arith.constant 0 : i32
    %c0_i32_0 = arith.constant 0 : i32
    %c0_i32_1 = arith.constant 0 : i32
    return %c0_i32, %c0_i32_0 : i32, i32
  }
  func.func @transform_6(%arg0: i32) -> (i32, i32) {
    %c0_i32 = arith.constant 0 : i32
    %c0_i32_0 = arith.constant 0 : i32
    %c0_i32_1 = arith.constant 0 : i32
    return %c0_i32, %c0_i32_0 : i32, i32
  }
  func.func @transform_7(%arg0: i32) -> (i32, i32) {
    %c0_i32 = arith.constant 0 : i32
    %c0_i32_0 = arith.constant 0 : i32
    %c0_i32_1 = arith.constant 0 : i32
    return %c0_i32, %c0_i32_0 : i32, i32
  }
  func.func @transform_8(%arg0: i32) -> (i32, i32) {
    %c0_i32 = arith.constant 0 : i32
    %c0_i32_0 = arith.constant 0 : i32
    %c0_i32_1 = arith.constant 0 : i32
    return %c0_i32, %c0_i32_0 : i32, i32
  }
  func.func @transform_9(%arg0: i32) -> (i32, i32) {
    %c0_i32 = arith.constant 0 : i32
    %c0_i32_0 = arith.constant 0 : i32
    %c0_i32_1 = arith.constant 0 : i32
    return %c0_i32, %c0_i32_0 : i32, i32
  }
  func.func @transform_10(%arg0: i32) -> (i32, i32) {
    %c0_i32 = arith.constant 0 : i32
    %c0_i32_0 = arith.constant 0 : i32
    %c0_i32_1 = arith.constant 0 : i32
    return %c0_i32, %c0_i32_0 : i32, i32
  }
  func.func @transform_11(%arg0: i32) -> (i32, i32) {
    %c0_i32 = arith.constant 0 : i32
    %c0_i32_0 = arith.constant 0 : i32
    %c0_i32_1 = arith.constant 0 : i32
    return %c0_i32, %c0_i32_0 : i32, i32
  }
  func.func @transform_12(%arg0: i32) -> (i32, i32) {
    %c0_i32 = arith.constant 0 : i32
    %c0_i32_0 = arith.constant 0 : i32
    %c0_i32_1 = arith.constant 0 : i32
    return %c0_i32, %c0_i32_0 : i32, i32
  }
  func.func @transform_13(%arg0: i32) -> (i32, i32) {
    %c0_i32 = arith.constant 0 : i32
    %c0_i32_0 = arith.constant 0 : i32
    %c0_i32_1 = arith.constant 0 : i32
    return %c0_i32, %c0_i32_0 : i32, i32
  }
  func.func @transform_14(%arg0: i32) -> (i32, i32) {
    %c0_i32 = arith.constant 0 : i32
    %c0_i32_0 = arith.constant 0 : i32
    %c0_i32_1 = arith.constant 0 : i32
    return %c0_i32, %c0_i32_0 : i32, i32
  }
  func.func @transform_15(%arg0: i32) -> (i32, i32) {
    %c0_i32 = arith.constant 0 : i32
    %c0_i32_0 = arith.constant 0 : i32
    %c0_i32_1 = arith.constant 0 : i32
    return %c0_i32, %c0_i32_0 : i32, i32
  }
  func.func @transform_16(%arg0: i32) -> (i32, i32) {
    %c0_i32 = arith.constant 0 : i32
    %c0_i32_0 = arith.constant 0 : i32
    %c0_i32_1 = arith.constant 0 : i32
    return %c0_i32, %c0_i32_0 : i32, i32
  }
  func.func @transform_17(%arg0: i32) -> (i32, i32) {
    %c0_i32 = arith.constant 0 : i32
    %c0_i32_0 = arith.constant 0 : i32
    %c0_i32_1 = arith.constant 0 : i32
    return %c0_i32, %c0_i32_0 : i32, i32
  }
  func.func @transform_18(%arg0: i32) -> (i32, i32) {
    %c0_i32 = arith.constant 0 : i32
    %c0_i32_0 = arith.constant 0 : i32
    %c0_i32_1 = arith.constant 0 : i32
    return %c0_i32, %c0_i32_0 : i32, i32
  }
  func.func @transform_19(%arg0: i32) -> (i32, i32) {
    %c0_i32 = arith.constant 0 : i32
    %c0_i32_0 = arith.constant 0 : i32
    %c0_i32_1 = arith.constant 0 : i32
    return %c0_i32, %c0_i32_0 : i32, i32
  }
  func.func @transform_20(%arg0: i32) -> (i32, i32) {
    %c0_i32 = arith.constant 0 : i32
    %c0_i32_0 = arith.constant 0 : i32
    %c0_i32_1 = arith.constant 0 : i32
    return %c0_i32, %c0_i32_0 : i32, i32
  }
  func.func @transform_21(%arg0: i32) -> (i32, i32, i32) {
    %c0_i32 = arith.constant 0 : i32
    %c0_i32_0 = arith.constant 0 : i32
    %c0_i32_1 = arith.constant 0 : i32
    return %arg0, %c0_i32, %c0_i32_0 : i32, i32, i32
  }
}

</mosaic_0001>

<bundles_post_ra>
// kernel: tpu_custom_call.1
= control target key start
LH: loop header
LB: loop body
LE: loop exit
PB: predicated region body
PF: predicated region fallthrough
CT: control target
= control target key end

     0   :  { %s3653_s0 = inlined_call_operand.vmem [shape: f32[8,9], index: 0, kind: input, shape index: {}]   ;;  %s3654_s1 = inlined_call_operand.vmem [shape: f32[5,8,5], index: 1, kind: input, shape index: {}]   ;;  %s3655_s2 = inlined_call_operand.vmem [shape: f32[9,64], index: 2, kind: input, shape index: {}]   ;;  %s3656_s3 = inlined_call_operand.hbm [shape: f32[1,64], index: 3, kind: input, shape index: {}]   ;;  %s3657_s4 = inlined_call_operand.vmem [shape: f32[64,32], index: 4, kind: input, shape index: {}]   ;;  %s3658_s5 = inlined_call_operand.hbm [shape: f32[1,32], index: 5, kind: input, shape index: {}]   ;;  %s3659_s6 = inlined_call_operand.hbm [shape: f32[5,64], index: 6, kind: input, shape index: {}]   ;;  %s3660_s7 = inlined_call_operand.hbm [shape: f32[1,64], index: 7, kind: input, shape index: {}]   ;;  %s3661_s8 = inlined_call_operand.vmem [shape: f32[64,32], index: 8, kind: input, shape index: {}]   ;;  %s3662_s9 = inlined_call_operand.hbm [shape: f32[1,32], index: 9, kind: input, shape index: {}]   ;;  %s3663_s10 = inlined_call_operand.vmem [shape: f32[32,32], index: 10, kind: input, shape index: {}]   ;;  %s3664_s11 = inlined_call_operand.hbm [shape: f32[32,32], index: 11, kind: input, shape index: {}]   ;;  %s3665_s12 = inlined_call_operand.hbm [shape: f32[32,32], index: 12, kind: input, shape index: {}]   ;;  %s3666_s13 = inlined_call_operand.hbm [shape: f32[32,32], index: 13, kind: input, shape index: {}]   ;;  %s3667_s14 = inlined_call_operand.hbm [shape: f32[1,32], index: 14, kind: input, shape index: {}]   ;;  %s3668_s15 = inlined_call_operand.hbm [shape: f32[32,128], index: 15, kind: input, shape index: {}]   ;;  %s3669_s16 = inlined_call_operand.hbm [shape: f32[1,128], index: 16, kind: input, shape index: {}]   ;;  %s3670_s17 = inlined_call_operand.vmem [shape: f32[128,128], index: 17, kind: input, shape index: {}]   ;;  %s3671_s18 = inlined_call_operand.vmem [shape: f32[1,128], index: 18, kind: input, shape index: {}]   ;;  %s3672_s19 = inlined_call_operand.vmem [shape: f32[1,128], index: 19, kind: input, shape index: {}]   ;;  %s3673_s20 = inlined_call_operand.<no memory space> [shape: f32[1,1], index: 20, kind: input, shape index: {}]   ;;  %s3674_s21 = inlined_call_operand.hbm [shape: f32[1,1,8], index: 21, kind: output, shape index: {}]  }
   0x1   :  { %3680 = sst [smem:[#allocation29_spill]] %s3653_s0  ;;  %v26_v0 = vstv %s3673_s20 }
   0x2   :  { %3681 = sst [smem:[#allocation30_spill]] %s3654_s1  ;;  %27 = vst [vmem:[#allocation2] sm:$0x1] %v26_v0 }
   0x3   :  { %3682 = sst [smem:[#allocation31_spill]] %s3655_s2 }
   0x4   :  { %3683 = sst [smem:[#allocation32_spill]] %s3656_s3 }
   0x5   :  { %3684 = sst [smem:[#allocation33_spill]] %s3657_s4 }
   0x6   :  { %3685 = sst [smem:[#allocation34_spill]] %s3658_s5 }
   0x7   :  { %28 = vsyncpa [#allocation4], 0 }
   0x8   :  { %29 = vsyncpa [#allocation7], 0 }
   0x9   :  { %30 = vsyncpa [#allocation10], 0 }
   0xa   :  { %31 = vsyncpa [#allocation13], 0 }
   0xb   :  { %32 = vsyncpa [#allocation16], 0 }
   0xc   :  { %33 = vsyncpa [#allocation19], 0 }
   0xd   :  { %34 = vsyncpa [#allocation5], 0  ;;  %s2640_s26 = smov [#allocation6]   ;;  %s2641_s3 = smov [#allocation9]  }
   0xe   :  { %s59_s27 = sshll.u32 %s2640_s26, 4  ;;  %s79_s28 = sshll.u32 %s2641_s3, 4  ;;  %s60_s27 = int_to_ptr.vmem [resolvable:$true] %s59_s27  ;;  %s80_s28 = int_to_ptr.vmem [resolvable:$true] %s79_s28 }
   0xf   :  { %s3686_s4 = sld [smem:[#allocation34_spill]] }
  0x15   :  { %s2362_s30 = scalar_lea.hbm %s3686_s4, 16 }
  0x16   :  { %p2363_p0 = scmp.ne.s32.totalorder %s3686_s4, %s2362_s30  ;;  %p2366_p1 = scmp.lt.u32.totalorder %s2362_s30, %s3686_s4 }
  0x18   :  { %p2368_p2 = pnand %p2366_p1, %p2363_p0 }
  0x1a   :  { %2371 = shalt.err (!%p2368_p2)
}
  0x1b   :  { %s2372_s1 = scalar_lea.vmem %s60_s27, 16  ;;  %s2376_s24 = scalar_lea.vmem %s60_s27, 32 }
  0x1c   :  { %p2373_p3 = scmp.ne.s32.totalorder %s60_s27, %s2372_s1  ;;  %p2377_p4 = scmp.lt.s32.totalorder %s60_s27, %s60_s27 }
  0x1d   :  { %p2378_p5 = scmp.lt.s32.totalorder %s2376_s24, %s2372_s1 }
  0x1f   :  { %p2379_p6 = por %p2378_p5, %p2377_p4 }
  0x21   :  { %p2380_p7 = pnand %p2379_p6, %p2373_p3 }
  0x23   :  { %2383 = shalt.err (!%p2380_p7)
}
  0x24   :  { %62 = dma.hbm_to_vmem [thread:$0]  %s3686_s4, 16, %s60_s27, [#allocation7]  }
  0x25   :  { %s2384_s29 = scalar_lea.hbm %s3660_s7, 16 }
  0x26   :  { %p2385_p8 = scmp.ne.s32.totalorder %s3660_s7, %s2384_s29  ;;  %p2388_p9 = scmp.lt.u32.totalorder %s2384_s29, %s3660_s7 }
  0x28   :  { %p2390_p10 = pnand %p2388_p9, %p2385_p8 }
  0x2a   :  { %2393 = shalt.err (!%p2390_p10)
}
  0x2b   :  { %s2394_s22 = scalar_lea.vmem %s80_s28, 16  ;;  %s2398_s23 = scalar_lea.vmem %s80_s28, 32 }
  0x2c   :  { %p2395_p11 = scmp.ne.s32.totalorder %s80_s28, %s2394_s22  ;;  %p2399_p12 = scmp.lt.s32.totalorder %s80_s28, %s80_s28 }
  0x2d   :  { %p2400_p13 = scmp.lt.s32.totalorder %s2398_s23, %s2394_s22 }
  0x2f   :  { %p2401_p0 = por %p2400_p13, %p2399_p12 }
  0x31   :  { %p2402_p1 = pnand %p2401_p0, %p2395_p11 }
  0x33   :  { %2405 = shalt.err (!%p2402_p1)
}
  0x34   :  { %82 = dma.hbm_to_vmem [thread:$0]  %s3660_s7, 16, %s80_s28, [#allocation10]  }
  0x35   :  { %s2642_s1 = smov [#allocation12]   ;;  %s2406_s26 = scalar_lea.hbm %s3664_s11, 512 }
  0x36   :  { %s102_s24 = sshll.u32 %s2642_s1, 4  ;;  %p2407_p2 = scmp.ne.s32.totalorder %s3664_s11, %s2406_s26  ;;  %s103_s24 = int_to_ptr.vmem [resolvable:$true] %s102_s24 }
  0x37   :  { %p2410_p3 = scmp.lt.u32.totalorder %s2406_s26, %s3664_s11 }
  0x39   :  { %p2412_p4 = pnand %p2410_p3, %p2407_p2 }
  0x3b   :  { %2415 = shalt.err (!%p2412_p4)
}
  0x3c   :  { %s2416_s5 = scalar_lea.vmem %s103_s24, 512  ;;  %p2421_p6 = scmp.lt.s32.totalorder %s103_s24, %s103_s24 }
  0x3d   :  { %p2417_p5 = scmp.ne.s32.totalorder %s103_s24, %s2416_s5  ;;  %p2422_p7 = scmp.lt.s32.totalorder %s2416_s5, %s2416_s5 }
  0x3f   :  { %p2423_p8 = por %p2422_p7, %p2421_p6 }
  0x41   :  { %p2424_p9 = pnand %p2423_p8, %p2417_p5 }
  0x43   :  { %2427 = shalt.err (!%p2424_p9)
}
  0x44   :  { %s2643_s7 = smov 128   ;;  %s2644_s28 = smov 8  }
  0x45   :  { %108 = dma.hbm_to_vmem [thread:$0]  %s3664_s11, 512, %s103_s24, [#allocation13], %s2643_s7, %s2643_s7, %s2644_s28  }
  0x46   :  { %s2645_s23 = smov [#allocation15]   ;;  %s2646_s4 = smov [#allocation18]  }
  0x47   :  { %s126_s27 = sshll.u32 %s2645_s23, 4  ;;  %s148_s1 = sshll.u32 %s2646_s4, 4  ;;  %s127_s27 = int_to_ptr.vmem [resolvable:$true] %s126_s27  ;;  %s149_s1 = int_to_ptr.vmem [resolvable:$true] %s148_s1 }
  0x48   :  { %s2428_s26 = scalar_lea.hbm %s3666_s13, 512 }
  0x49   :  { %p2429_p10 = scmp.ne.s32.totalorder %s3666_s13, %s2428_s26  ;;  %p2432_p11 = scmp.lt.u32.totalorder %s2428_s26, %s3666_s13 }
  0x4b   :  { %p2434_p12 = pnand %p2432_p11, %p2429_p10 }
  0x4d   :  { %2437 = shalt.err (!%p2434_p12)
}
  0x4e   :  { %s2438_s11 = scalar_lea.vmem %s127_s27, 512  ;;  %p2443_p0 = scmp.lt.s32.totalorder %s127_s27, %s127_s27 }
  0x4f   :  { %p2439_p13 = scmp.ne.s32.totalorder %s127_s27, %s2438_s11  ;;  %p2444_p1 = scmp.lt.s32.totalorder %s2438_s11, %s2438_s11 }
  0x51   :  { %p2445_p2 = por %p2444_p1, %p2443_p0 }
  0x53   :  { %p2446_p3 = pnand %p2445_p2, %p2439_p13 }
  0x55   :  { %2449 = shalt.err (!%p2446_p3)
}
  0x56   :  { %132 = dma.hbm_to_vmem [thread:$0]  %s3666_s13, 512, %s127_s27, [#allocation16], %s2643_s7, %s2643_s7, %s2644_s28  }
  0x57   :  { %s2450_s23 = scalar_lea.hbm %s3668_s15, 512 }
  0x58   :  { %p2451_p4 = scmp.ne.s32.totalorder %s3668_s15, %s2450_s23  ;;  %p2454_p5 = scmp.lt.u32.totalorder %s2450_s23, %s3668_s15 }
  0x5a   :  { %p2456_p6 = pnand %p2454_p5, %p2451_p4 }
  0x5c   :  { %2459 = shalt.err (!%p2456_p6)
}
  0x5d   :  { %s2460_s3 = scalar_lea.vmem %s149_s1, 512  ;;  %p2465_p8 = scmp.lt.s32.totalorder %s149_s1, %s149_s1 }
  0x5e   :  { %p2461_p7 = scmp.ne.s32.totalorder %s149_s1, %s2460_s3  ;;  %p2466_p9 = scmp.lt.s32.totalorder %s2460_s3, %s2460_s3 }
  0x60   :  { %p2467_p10 = por %p2466_p9, %p2465_p8 }
  0x62   :  { %p2468_p11 = pnand %p2467_p10, %p2461_p7 }
  0x64   :  { %2471 = shalt.err (!%p2468_p11)
}
  0x65   :  { %154 = dma.hbm_to_vmem [thread:$0]  %s3668_s15, 512, %s149_s1, [#allocation19], %s2643_s7, %s2643_s7, %s2644_s28  }
  0x66   :  { %s2647_s29 = smov [#allocation3]   ;;  %s2648_s30 = smov [#allocation8]  }
  0x67   :  { %s47_s0 = sshll.u32 %s2647_s29, 4  ;;  %s69_s11 = sshll.u32 %s2648_s30, 4  ;;  %s48_s0 = int_to_ptr.vmem [resolvable:$true] %s47_s0  ;;  %s70_s11 = int_to_ptr.vmem [resolvable:$true] %s69_s11 }
  0x68   :  { %s3687_s20 = sld [smem:[#allocation32_spill]] }
  0x6e   :  { %s2472_s22 = scalar_lea.hbm %s3687_s20, 16 }
  0x6f   :  { %p2473_p12 = scmp.ne.s32.totalorder %s3687_s20, %s2472_s22  ;;  %p2476_p13 = scmp.lt.u32.totalorder %s2472_s22, %s3687_s20 }
  0x71   :  { %p2478_p0 = pnand %p2476_p13, %p2473_p12 }
  0x73   :  { %2481 = shalt.err (!%p2478_p0)
}
  0x74   :  { %s2482_s15 = scalar_lea.vmem %s48_s0, 16  ;;  %s2486_s1 = scalar_lea.vmem %s48_s0, 32 }
  0x75   :  { %p2483_p1 = scmp.ne.s32.totalorder %s48_s0, %s2482_s15  ;;  %p2487_p2 = scmp.lt.s32.totalorder %s48_s0, %s48_s0 }
  0x76   :  { %p2488_p3 = scmp.lt.s32.totalorder %s2486_s1, %s2482_s15 }
  0x78   :  { %p2489_p4 = por %p2488_p3, %p2487_p2 }
  0x7a   :  { %p2490_p5 = pnand %p2489_p4, %p2483_p1 }
  0x7c   :  { %2493 = shalt.err (!%p2490_p5)
}
  0x7d   :  { %50 = dma.hbm_to_vmem [thread:$0]  %s3687_s20, 16, %s48_s0, [#allocation4]  }
  0x7e   :  { %s2494_s29 = scalar_lea.hbm %s3659_s6, 128 }
  0x7f   :  { %p2495_p6 = scmp.ne.s32.totalorder %s3659_s6, %s2494_s29  ;;  %p2498_p7 = scmp.lt.u32.totalorder %s2494_s29, %s3659_s6 }
  0x81   :  { %p2500_p8 = pnand %p2498_p7, %p2495_p6 }
  0x83   :  { %2503 = shalt.err (!%p2500_p8)
}
  0x84   :  { %s2504_s23 = scalar_lea.vmem %s70_s11, 128  ;;  %p2509_p10 = scmp.lt.s32.totalorder %s70_s11, %s70_s11 }
  0x85   :  { %p2505_p9 = scmp.ne.s32.totalorder %s70_s11, %s2504_s23  ;;  %p2510_p11 = scmp.lt.s32.totalorder %s2504_s23, %s2504_s23 }
  0x87   :  { %p2511_p12 = por %p2510_p11, %p2509_p10 }
  0x89   :  { %p2512_p13 = pnand %p2511_p12, %p2505_p9 }
  0x8b   :  { %2515 = shalt.err (!%p2512_p13)
}
  0x8c   :  { %72 = dma.hbm_to_vmem [thread:$0]  %s3659_s6, 128, %s70_s11, [#allocation7]  }
  0x8d   :  { %s2649_s4 = smov [#allocation11]   ;;  %s2650_s25 = smov [#allocation14]  }
  0x8e   :  { %s91_s2 = sshll.u32 %s2649_s4, 4  ;;  %s114_s15 = sshll.u32 %s2650_s25, 4  ;;  %s92_s2 = int_to_ptr.vmem [resolvable:$true] %s91_s2  ;;  %s115_s15 = int_to_ptr.vmem [resolvable:$true] %s114_s15 }
  0x8f   :  { %s2516_s3 = scalar_lea.hbm %s3662_s9, 16 }
  0x90   :  { %p2517_p0 = scmp.ne.s32.totalorder %s3662_s9, %s2516_s3  ;;  %p2520_p1 = scmp.lt.u32.totalorder %s2516_s3, %s3662_s9 }
  0x92   :  { %p2522_p2 = pnand %p2520_p1, %p2517_p0 }
  0x94   :  { %2525 = shalt.err (!%p2522_p2)
}
  0x95   :  { %s2526_s6 = scalar_lea.vmem %s92_s2, 16  ;;  %s2530_s11 = scalar_lea.vmem %s92_s2, 32 }
  0x96   :  { %p2527_p3 = scmp.ne.s32.totalorder %s92_s2, %s2526_s6  ;;  %p2531_p4 = scmp.lt.s32.totalorder %s92_s2, %s92_s2 }
  0x97   :  { %p2532_p5 = scmp.lt.s32.totalorder %s2530_s11, %s2526_s6 }
  0x99   :  { %p2533_p6 = por %p2532_p5, %p2531_p4 }
  0x9b   :  { %p2534_p7 = pnand %p2533_p6, %p2527_p3 }
  0x9d   :  { %2537 = shalt.err (!%p2534_p7)
}
  0x9e   :  { %94 = dma.hbm_to_vmem [thread:$0]  %s3662_s9, 16, %s92_s2, [#allocation10]  }
  0x9f   :  { %s2538_s0 = scalar_lea.hbm %s3665_s12, 512 }
  0xa0   :  { %p2539_p8 = scmp.ne.s32.totalorder %s3665_s12, %s2538_s0  ;;  %p2542_p9 = scmp.lt.u32.totalorder %s2538_s0, %s3665_s12 }
  0xa2   :  { %p2544_p10 = pnand %p2542_p9, %p2539_p8 }
  0xa4   :  { %2547 = shalt.err (!%p2544_p10)
}
  0xa5   :  { %s2548_s26 = scalar_lea.vmem %s115_s15, 512  ;;  %p2553_p12 = scmp.lt.s32.totalorder %s115_s15, %s115_s15 }
  0xa6   :  { %p2549_p11 = scmp.ne.s32.totalorder %s115_s15, %s2548_s26  ;;  %p2554_p13 = scmp.lt.s32.totalorder %s2548_s26, %s2548_s26 }
  0xa8   :  { %p2555_p0 = por %p2554_p13, %p2553_p12 }
  0xaa   :  { %p2556_p1 = pnand %p2555_p0, %p2549_p11 }
  0xac   :  { %2559 = shalt.err (!%p2556_p1)
}
  0xad   :  { %120 = dma.hbm_to_vmem [thread:$0]  %s3665_s12, 512, %s115_s15, [#allocation13], %s2643_s7, %s2643_s7, %s2644_s28  }
  0xae   :  { %s2651_s3 = smov [#allocation17]   ;;  %s2652_s27 = smov [#allocation20]  }
  0xaf   :  { %s139_s13 = sshll.u32 %s2651_s3, 4  ;;  %s161_s29 = sshll.u32 %s2652_s27, 4  ;;  %s140_s13 = int_to_ptr.vmem [resolvable:$true] %s139_s13  ;;  %s162_s29 = int_to_ptr.vmem [resolvable:$true] %s161_s29 }
  0xb0   :  { %s2560_s11 = scalar_lea.hbm %s3667_s14, 16 }
  0xb1   :  { %p2561_p2 = scmp.ne.s32.totalorder %s3667_s14, %s2560_s11  ;;  %p2564_p3 = scmp.lt.u32.totalorder %s2560_s11, %s3667_s14 }
  0xb3   :  { %p2566_p4 = pnand %p2564_p3, %p2561_p2 }
  0xb5   :  { %2569 = shalt.err (!%p2566_p4)
}
  0xb6   :  { %s2570_s12 = scalar_lea.vmem %s140_s13, 16  ;;  %s2574_s7 = scalar_lea.vmem %s140_s13, 32 }
  0xb7   :  { %p2571_p5 = scmp.ne.s32.totalorder %s140_s13, %s2570_s12  ;;  %p2575_p6 = scmp.lt.s32.totalorder %s140_s13, %s140_s13 }
  0xb8   :  { %p2576_p7 = scmp.lt.s32.totalorder %s2574_s7, %s2570_s12 }
  0xba   :  { %p2577_p8 = por %p2576_p7, %p2575_p6 }
  0xbc   :  { %p2578_p9 = pnand %p2577_p8, %p2571_p5 }
  0xbe   :  { %2581 = shalt.err (!%p2578_p9)
}
  0xbf   :  { %142 = dma.hbm_to_vmem [thread:$0]  %s3667_s14, 16, %s140_s13, [#allocation16]  }
  0xc0   :  { %s2582_s4 = scalar_lea.hbm %s3669_s16, 16 }
  0xc1   :  { %p2583_p10 = scmp.ne.s32.totalorder %s3669_s16, %s2582_s4  ;;  %p2586_p11 = scmp.lt.u32.totalorder %s2582_s4, %s3669_s16 }
  0xc3   :  { %p2588_p12 = pnand %p2586_p11, %p2583_p10 }
  0xc5   :  { %2591 = shalt.err (!%p2588_p12)
}
  0xc6   :  { %s2592_s2 = scalar_lea.vmem %s162_s29, 16  ;;  %s2596_s3 = scalar_lea.vmem %s162_s29, 32 }
  0xc7   :  { %p2593_p13 = scmp.ne.s32.totalorder %s162_s29, %s2592_s2  ;;  %p2597_p0 = scmp.lt.s32.totalorder %s162_s29, %s162_s29 }
  0xc8   :  { %p2598_p1 = scmp.lt.s32.totalorder %s2596_s3, %s2592_s2 }
  0xca   :  { %p2599_p2 = por %p2598_p1, %p2597_p0 }
  0xcc   :  { %p2600_p3 = pnand %p2599_p2, %p2593_p13 }
  0xce   :  { %2603 = shalt.err (!%p2600_p3)
}
  0xcf   :  { %164 = dma.hbm_to_vmem [thread:$0]  %s3669_s16, 16, %s162_s29, [#allocation19]  }
  0xd0   :  { %2626 = dma.done.wait [#allocation4], 16  }
  0xd1   :  { %2627 = vsyncadd [#allocation4], 4294967280 }
  0xd2   :  { %2628 = dma.done.wait [#allocation7], 144  }
  0xd3   :  { %2629 = vsyncadd [#allocation7], 4294967152 }
  0xd4   :  { %2630 = dma.done.wait [#allocation10], 32  }
  0xd5   :  { %2631 = vsyncadd [#allocation10], 4294967264 }
  0xd6   :  { %2632 = dma.done.wait [#allocation13], 1024  }
  0xd7   :  { %2633 = vsyncadd [#allocation13], 4294966272 }
  0xd8   :  { %2634 = dma.done.wait [#allocation16], 528  }
  0xd9   :  { %2635 = vsyncadd [#allocation16], 4294966768 }
  0xda   :  { %2636 = dma.done.wait [#allocation19], 528  }
  0xdb   :  { %2637 = vsyncadd [#allocation19], 4294966768  ;;  %v2653_v1 = vmov 0.0|0.0   ;;  %vm2654_vm0 = vmmov 0   ;;  %v2655_v2 = vmov 0.0   ;;  %vm220_vm1 = vcmask 1040384  }
  0xdc   :  { %2170 = vmatprep.subr.bf16.mxu0 %v2653_v1  ;;  %2174 = vmatprep.subr.bf16.mxu1 %v2653_v1  ;;  %s3688_s29 = sld [smem:[#allocation31_spill]]  ;;  %vm2656_vm2 = vmmov 1   ;;  %s3689_s5 = sld [smem:[#allocation29_spill]]  ;;  %v390_v7 = vld [vmem:[#allocation8] sm:$0x1f]  ;;  %vm216_vm4 = vcmask 72704  }
  0xdd   :  { %1987 = vmatprep.mubr.msk.f32.mxu0 %vm2654_vm0, %v2655_v2  ;;  %2006 = vmatprep.mubr.msk.f32.mxu1 %vm2654_vm0, %v2655_v2  ;;  %vm2172_vm3 = vmpackc.low %vm220_vm1, %vm2656_vm2  ;;  %s3690_s12 = sld [smem:[#allocation33_spill]]  ;;  %v513_v10 = vld [vmem:[%s3661_s8] sm:$0xff]  ;;  %vm414_vm5 = vcmask 1044480   ;;  %v514_v12 = vld [vmem:[%s3661_s8 + $0x8] sm:$0xff]  ;;  %s3691_s14 = sld [smem:[#allocation30_spill]]  ;;  %vm398_vm6 = vcmask 39936  }
  0xde   :  { %v2187_v17 = vpack.c.bf16 %v514_v12, %v513_v10  ;;  %v515_v20 = vld [vmem:[%s3661_s8 + $0x10] sm:$0xff]  ;;  %v516_v21 = vld [vmem:[%s3661_s8 + $0x18] sm:$0xff]  ;;  %v517_v28 = vld [vmem:[%s3661_s8 + $0x20] sm:$0xff]  ;;  %vm310_vm7 = vcmask 523264   ;;  %vm642_vm8 = vcmask 261120   ;;  %s2658_s25 = smov [#allocation21]  }
  0xdf   :  { %v2190_v24 = vpack.c.bf16 %v516_v21, %v515_v20  ;;  %v518_v29 = vld [vmem:[%s3661_s8 + $0x28] sm:$0xff]  ;;  %v519_v34 = vld [vmem:[%s3661_s8 + $0x30] sm:$0xff]  ;;  %v520_v35 = vld [vmem:[%s3661_s8 + $0x38] sm:$0xff]  ;;  %s1838_s1 = sshll.u32 %s2658_s25, 4  ;;  %vm1830_vm9 = vcmask 57344   ;;  %s1839_s1 = int_to_ptr.vmem [resolvable:$true] %s1838_s1 }
  0xe0   :  { %v2193_v31 = vpack.c.bf16 %v518_v29, %v517_v28  ;;  %v2196_v36 = vpack.c.bf16 %v520_v35, %v519_v34  ;;  %v1852_v37 = vld [vmem:[#allocation3] ss:$0 sm:$0xff]  ;;  %v1857_v41 = vld [vmem:[#allocation9] ss:$0 sm:$0xff]  ;;  %s2608_s26 = scalar_lea.vmem %s1839_s1, 32  ;;  %p2609_p5 = scmp.lt.s32.totalorder %s1839_s1, %s1839_s1 }
  0xe1   :  { %v638_v63 = vld [vmem:[%s3663_s10] sm:$0xff]  ;;  %v639_v0 = vld [vmem:[%s3663_s10 + $0x8] sm:$0xff] }
  0xe2   :  { %v207_v3 = vld [vmem:[%s3688_s29] sm:$0xff]  ;;  %v208_v4 = vld [vmem:[%s3688_s29 + $0x8] sm:$0x1] }
  0xe3   :  { %v2171_v5 = vpack.c.bf16 %v208_v4, %v207_v3  ;;  %v206_v6 = vld [vmem:[%s3689_s5] sm:$0xff]  ;;  %v296_v9 = vld [vmem:[%s3690_s12 + $0x8] sm:$0xff]  ;;  %v297_v13 = vld [vmem:[%s3690_s12 + $0x10] sm:$0xff]  ;;  %v2198_v3 = vpack.c.bf16 %v639_v0, %v638_v63 }
  0xe4   :  { %v295_v8 = vld [vmem:[%s3690_s12] sm:$0xff]  ;;  %v298_v14 = vld [vmem:[%s3690_s12 + $0x18] sm:$0xff]  ;;  %v300_v19 = vld [vmem:[%s3690_s12 + $0x28] sm:$0xff] }
  0xe5   :  { %2173 = vmatpush3.bf16.msk.msra.mxu0 %vm2172_vm3, %v2171_v5  ;;  %v2175_v11 = vpack.c.bf16 %v296_v9, %v295_v8  ;;  %v2178_v15 = vpack.c.bf16 %v298_v14, %v297_v13  ;;  %v385_v16 = vld [vmem:[%s3691_s14] sm:$0xff]  ;;  %v386_v23 = vld [vmem:[%s3691_s14 + $0x8] sm:$0xff]  ;;  %v387_v25 = vld [vmem:[%s3691_s14 + $0x10] sm:$0xff] }
  0xe6   :  { %2009 = vmatprep.subr.mxu0 %v2655_v2  ;;  %v299_v18 = vld [vmem:[%s3690_s12 + $0x20] sm:$0xff]  ;;  %v388_v26 = vld [vmem:[%s3691_s14 + $0x18] sm:$0xff]  ;;  %v301_v30 = vld [vmem:[%s3690_s12 + $0x30] sm:$0xff] }
  0xe7   :  { %2176 = vmatpush3.bf16.msra.mxu1 %v2175_v11  ;;  %v2181_v22 = vpack.c.bf16 %v300_v19, %v299_v18  ;;  %v389_v27 = vld [vmem:[%s3691_s14 + $0x20] sm:$0xff]  ;;  %v302_v32 = vld [vmem:[%s3690_s12 + $0x38] sm:$0xff]  ;;  %v640_v4 = vld [vmem:[%s3663_s10 + $0x10] sm:$0xff] }
  0xe8   :  { %1988 = vmatmul.mubr.msk.f32.vlgmr.msra.gmra.mrb[0].mxu0 %vm216_vm4, %v206_v6  ;;  %2177 = vmatprep.subr.bf16.mxu1 %v2653_v1  ;;  %v2184_v33 = vpack.c.bf16 %v302_v32, %v301_v30  ;;  %v641_v5 = vld [vmem:[%s3663_s10 + $0x18] sm:$0xff]  ;;  %v1864_v11 = vld [vmem:[#allocation11] ss:$0 sm:$0xff] }
  0xe9   :  { %2010 = vmatpush3.msk.msra.mxu0 %vm414_vm5, %v390_v7  ;;  %2011 = vmatprep.mubr.msk.f32.mxu0 %vm2654_vm0, %v2655_v2  ;;  %v2202_v6 = vpack.c.bf16 %v641_v5, %v640_v4  ;;  %v1855_v7 = vld [vmem:[#allocation6] ss:$0 sm:$0xff] }
  0xea   :  { %2186 = vmatprep.subr.bf16.mxu0 %v2653_v1 }
  0xeb   :  { %2179 = vmatpush3.bf16.msra.mxu1 %v2178_v15 }
  0xec   :  { %2012 = vmatmul.mubr.msk.f32.vlgmr.msra.gmra.mrb[2].mxu0 %vm398_vm6, %v385_v16  ;;  %2180 = vmatprep.subr.bf16.mxu1 %v2653_v1 }
  0xed   :  { %2014 = vmatprep.mubr.msk.f32.mxu0 %vm2654_vm0, %v2655_v2  ;;  %2188 = vmatpush3.bf16.msra.mxu0 %v2187_v17 }
  0xee   :  { %2189 = vmatprep.subr.bf16.mxu0 %v2653_v1 }
  0xef   :  { %2182 = vmatpush3.bf16.msra.mxu1 %v2181_v22 }
  0xf0   :  { %2015 = vmatmul.mubr.msk.f32.gmra.mrb[4].mxu0 %vm398_vm6, %v386_v23  ;;  %2183 = vmatprep.subr.bf16.mxu1 %v2653_v1 }
  0xf1   :  { %2017 = vmatprep.mubr.msk.f32.mxu0 %vm2654_vm0, %v2655_v2  ;;  %2191 = vmatpush3.bf16.msra.mxu0 %v2190_v24 }
  0xf2   :  { %2192 = vmatprep.subr.bf16.mxu0 %v2653_v1 }
  0xf3   :  { %2185 = vmatpush3.bf16.msra.mxu1 %v2184_v33 }
  0xf4   :  { %2018 = vmatmul.mubr.msk.f32.gmra.mrb[6].mxu0 %vm398_vm6, %v387_v25  ;;  %2199 = vmatprep.subr.bf16.mxu1 %v2198_v3 }
  0xf5   :  { %2020 = vmatprep.mubr.msk.f32.mxu0 %vm2654_vm0, %v2655_v2  ;;  %2194 = vmatpush3.bf16.msra.mxu0 %v2193_v31 }
  0xf6   :  { %2195 = vmatprep.subr.bf16.mxu0 %v2653_v1 }
  0xf8   :  { %2021 = vmatmul.mubr.msk.f32.gmra.mrb[8].mxu0 %vm398_vm6, %v388_v26 }
  0xf9   :  { %2023 = vmatprep.mubr.msk.f32.mxu0 %vm2654_vm0, %v2655_v2  ;;  %2197 = vmatpush3.bf16.msra.mxu0 %v2196_v36 }
  0xfa   :  { %2234 = vmatprep.subr.bf16.mxu0 %v2653_v1 }
  0xfc   :  { %2024 = vmatmul.mubr.msk.f32.gmra.mrb[10].mxu0 %vm398_vm6, %v389_v27 }
  0xfd   :  { %2042 = vmatprep.mubr.msk.f32.mxu0 %vm2654_vm0, %v2655_v2 }
 0x1bb   :  { %v290_v38 = vpop.f32.mrb[0].mxu0 }
 0x1bc   :  { %v291_v39 = vadd.f32 %v1852_v37, %v290_v38  ;;  %v1989_v40 = vpop.f32.mrb[1].mxu0 }
 0x1be   :  { %v294_v42 = vmax.f32 %v291_v39, 0.0 }
 0x1bf   :  { %v484_v43 = vpop.f32.mrb[2].mxu0 }
 0x1c0   :  { %v485_v44 = vadd.f32 %v1857_v41, %v484_v43  ;;  %2007 = vmatmul.mubr.msk.f32.vlgmr.msra.gmra.mrb[0].mxu1 %vm310_vm7, %v294_v42  ;;  %v2013_v45 = vpop.f32.mrb[3].mxu0 }
 0x1c1   :  { %2201 = vmatpush3.bf16.msra.mxu1 %v2198_v3 }
 0x1c2   :  { %v508_v46 = vmax.f32 %v485_v44, 0.0  ;;  %2203 = vmatprep.subr.bf16.mxu1 %v2202_v6 }
 0x1c3   :  { %v489_v47 = vpop.f32.mrb[4].mxu0 }
 0x1c4   :  { %v490_v48 = vadd.f32 %v1857_v41, %v489_v47  ;;  %2043 = vmatmul.mubr.msk.f32.vlgmr.msra.gmra.mrb[12].mxu0 %vm310_vm7, %v508_v46  ;;  %v2016_v49 = vpop.f32.mrb[5].mxu0 }
 0x1c5   :  { %2045 = vmatprep.mubr.msk.f32.mxu0 %vm2654_vm0, %v2655_v2  ;;  %2205 = vmatpush3.bf16.msra.mxu1 %v2202_v6 }
 0x1c6   :  { %v509_v50 = vmax.f32 %v490_v48, 0.0 }
 0x1c7   :  { %v494_v51 = vpop.f32.mrb[6].mxu0 }
 0x1c8   :  { %v495_v52 = vadd.f32 %v1857_v41, %v494_v51  ;;  %2046 = vmatmul.mubr.msk.f32.gmra.mrb[14].mxu0 %vm310_vm7, %v509_v50  ;;  %v2019_v53 = vpop.f32.mrb[7].mxu0 }
 0x1c9   :  { %2048 = vmatprep.mubr.msk.f32.mxu0 %vm2654_vm0, %v2655_v2 }
 0x1ca   :  { %v510_v54 = vmax.f32 %v495_v52, 0.0 }
 0x1cb   :  { %v499_v55 = vpop.f32.mrb[8].mxu0 }
 0x1cc   :  { %v500_v56 = vadd.f32 %v1857_v41, %v499_v55  ;;  %2049 = vmatmul.mubr.msk.f32.gmra.mrb[16].mxu0 %vm310_vm7, %v510_v54  ;;  %v2022_v57 = vpop.f32.mrb[9].mxu0 }
 0x1cd   :  { %2051 = vmatprep.mubr.msk.f32.mxu0 %vm2654_vm0, %v2655_v2 }
 0x1ce   :  { %v511_v58 = vmax.f32 %v500_v56, 0.0 }
 0x1cf   :  { %v504_v59 = vpop.f32.mrb[10].mxu0 }
 0x1d0   :  { %v505_v60 = vadd.f32 %v1857_v41, %v504_v59  ;;  %2052 = vmatmul.mubr.msk.f32.gmra.mrb[18].mxu0 %vm310_vm7, %v511_v58  ;;  %v2025_v61 = vpop.f32.mrb[11].mxu0 }
 0x1d1   :  { %2054 = vmatprep.mubr.msk.f32.mxu0 %vm2654_vm0, %v2655_v2 }
 0x1d2   :  { %v512_v62 = vmax.f32 %v505_v60, 0.0 }
 0x1d4   :  { %2055 = vmatmul.mubr.msk.f32.gmra.mrb[20].mxu0 %vm310_vm7, %v512_v62 }
 0x1d5   :  { %2162 = vmatprep.mubr.msk.f32.mxu0 %vm2654_vm0, %v2655_v2 }
 0x293   :  { %v380_v8 = vpop.f32.mrb[0].mxu1 }
 0x294   :  { %v381_v9 = vadd.f32 %v1855_v7, %v380_v8  ;;  %v2008_v10 = vpop.f32.mrb[1].mxu1 }
 0x296   :  { %v3048_v12 = vmax.f32 %v381_v9, 0.0 }
 0x297   :  { %v609_v13 = vpop.f32.mrb[12].mxu0 }
 0x298   :  { %v610_v14 = vadd.f32 %v1864_v11, %v609_v13  ;;  %v2044_v15 = vpop.f32.mrb[13].mxu0  ;;  %2065 = vmatprep.mubr.msk.f32.mxu1 %vm642_vm8, %v3048_v12 }
 0x29a   :  { %v3052_v16 = vmax.f32 %v610_v14, 0.0 }
 0x29b   :  { %v614_v17 = vpop.f32.mrb[14].mxu0 }
 0x29c   :  { %2066 = vmatmul.mubr.msk.f32.vlgmr.msra.gmra.mrb[2].mxu1 %vm642_vm8, %v3052_v16  ;;  %v615_v18 = vadd.f32 %v1864_v11, %v614_v17  ;;  %v2047_v19 = vpop.f32.mrb[15].mxu0 }
 0x29e   :  { %v3056_v20 = vmax.f32 %v615_v18, 0.0 }
 0x29f   :  { %v619_v21 = vpop.f32.mrb[16].mxu0 }
 0x2a0   :  { %v620_v22 = vadd.f32 %v1864_v11, %v619_v21  ;;  %2068 = vmatprep.mubr.msk.f32.mxu1 %vm642_vm8, %v3056_v20  ;;  %v2050_v23 = vpop.f32.mrb[17].mxu0 }
 0x2a2   :  { %v3060_v24 = vmax.f32 %v620_v22, 0.0 }
 0x2a3   :  { %v624_v25 = vpop.f32.mrb[18].mxu0 }
 0x2a4   :  { %2069 = vmatmul.mubr.msk.f32.gmra.mrb[4].mxu1 %vm642_vm8, %v3060_v24  ;;  %v625_v26 = vadd.f32 %v1864_v11, %v624_v25  ;;  %v2053_v27 = vpop.f32.mrb[19].mxu0 }
 0x2a6   :  { %v3064_v28 = vmax.f32 %v625_v26, 0.0 }
 0x2a7   :  { %v629_v29 = vpop.f32.mrb[20].mxu0 }
 0x2a8   :  { %v630_v30 = vadd.f32 %v1864_v11, %v629_v29  ;;  %2071 = vmatprep.mubr.msk.f32.mxu1 %vm642_vm8, %v3064_v28  ;;  %v2056_v31 = vpop.f32.mrb[21].mxu0 }
 0x2aa   :  { %v3068_v32 = vmax.f32 %v630_v30, 0.0 }
 0x2ac   :  { %2072 = vmatmul.mubr.msk.f32.gmra.mrb[6].mxu1 %vm642_vm8, %v3068_v32 }
 0x36f   :  { %v2067_v33 = vpop.f32.mrb[2].mxu1 }
 0x370   :  { %v727_v34 = vpop.f32.mrb[3].mxu1  ;;  %v757_v35 = vmul.f32 %v2067_v33, %v3048_v12  ;;  %v781_v38 = vmul.f32 %v2067_v33, %v3052_v16  ;;  %v805_v42 = vmul.f32 %v2067_v33, %v3056_v20  ;;  %v829_v48 = vmul.f32 %v2067_v33, %v3060_v24 }
 0x371   :  { %v756_v36 = vmul.f32 %v727_v34, %v3048_v12  ;;  %v780_v40 = vmul.f32 %v727_v34, %v3052_v16  ;;  %v804_v45 = vmul.f32 %v727_v34, %v3056_v20  ;;  %v828_v50 = vmul.f32 %v727_v34, %v3060_v24 }
 0x372   :  { %v765_v37 = vsel %vm642_vm8, %v757_v35, 0.0  ;;  %v789_v41 = vsel %vm642_vm8, %v781_v38, 0.0  ;;  %v813_v47 = vsel %vm642_vm8, %v805_v42, 0.0  ;;  %v837_v51 = vsel %vm642_vm8, %v829_v48, 0.0 }
 0x373   :  { %766 = vadd.xlane.f32.xlu1 %v765_v37  ;;  %v762_v39 = vsel %vm642_vm8, %v756_v36, 0.0  ;;  %v786_v44 = vsel %vm642_vm8, %v780_v40, 0.0  ;;  %v810_v49 = vsel %vm642_vm8, %v804_v45, 0.0  ;;  %v853_v52 = vmul.f32 %v2067_v33, %v3064_v28 }
 0x374   :  { %763 = vadd.xlane.f32.xlu0 %v762_v39  ;;  %v834_v54 = vsel %vm642_vm8, %v828_v50, 0.0  ;;  %v877_v58 = vmul.f32 %v2067_v33, %v3068_v32  ;;  %v852_v62 = vmul.f32 %v727_v34, %v3064_v28  ;;  %v876_v4 = vmul.f32 %v727_v34, %v3068_v32 }
 0x375   :  { %v861_v57 = vsel %vm642_vm8, %v853_v52, 0.0 }
 0x376   :  { %v885_v61 = vsel %vm642_vm8, %v877_v58, 0.0  ;;  %v858_v3 = vsel %vm642_vm8, %v852_v62, 0.0  ;;  %v882_v7 = vsel %vm642_vm8, %v876_v4, 0.0  ;;  %v1177_v58 = vld [vmem:[#allocation12 + $0x8] sm:$0xff] }
 0x377   :  { %790 = vadd.xlane.f32.xlu1 %v789_v41  ;;  %v3080_v43 = vpop.f32.mrb[4].mxu1 }
 0x378   :  { %787 = vadd.xlane.f32.xlu0 %v786_v44  ;;  %v737_v46 = vpop.f32.mrb[5].mxu1  ;;  %v783_v55 = vmul.f32 %v3080_v43, %v3052_v16  ;;  %v807_v60 = vmul.f32 %v3080_v43, %v3056_v20  ;;  %v831_v0 = vmul.f32 %v3080_v43, %v3060_v24  ;;  %v759_v8 = vmul.f32 %v3080_v43, %v3048_v12 }
 0x379   :  { %v758_v6 = vmul.f32 %v737_v46, %v3048_v12  ;;  %v806_v10 = vmul.f32 %v737_v46, %v3056_v20  ;;  %v855_v13 = vmul.f32 %v3080_v43, %v3064_v28  ;;  %v830_v15 = vmul.f32 %v737_v46, %v3060_v24 }
 0x37a   :  { %v795_v59 = vsel %vm642_vm8, %v783_v55, 0.0  ;;  %v819_v63 = vsel %vm642_vm8, %v807_v60, 0.0  ;;  %v843_v5 = vsel %vm642_vm8, %v831_v0, 0.0  ;;  %v771_v11 = vsel %vm642_vm8, %v759_v8, 0.0  ;;  %v1178_v60 = vld [vmem:[#allocation12 + $0x10] sm:$0xff] }
 0x37b   :  { %814 = vadd.xlane.f32.xlu1 %v813_v47  ;;  %v768_v9 = vsel %vm642_vm8, %v758_v6, 0.0  ;;  %v816_v14 = vsel %vm642_vm8, %v806_v10, 0.0  ;;  %v867_v17 = vsel %vm642_vm8, %v855_v13, 0.0  ;;  %v782_v18 = vmul.f32 %v737_v46, %v3052_v16 }
 0x37c   :  { %811 = vadd.xlane.f32.xlu0 %v810_v49  ;;  %v840_v19 = vsel %vm642_vm8, %v830_v15, 0.0  ;;  %v854_v23 = vmul.f32 %v737_v46, %v3064_v28  ;;  %v878_v29 = vmul.f32 %v737_v46, %v3068_v32  ;;  %v879_v42 = vmul.f32 %v3080_v43, %v3068_v32 }
 0x37d   :  { %v792_v22 = vsel %vm642_vm8, %v782_v18, 0.0 }
 0x37e   :  { %v864_v27 = vsel %vm642_vm8, %v854_v23, 0.0  ;;  %v888_v33 = vsel %vm642_vm8, %v878_v29, 0.0  ;;  %v891_v46 = vsel %vm642_vm8, %v879_v42, 0.0 }
 0x37f   :  { %838 = vadd.xlane.f32.xlu1 %v837_v51  ;;  %v3090_v53 = vpop.f32.mrb[6].mxu1 }
 0x380   :  { %835 = vadd.xlane.f32.xlu0 %v834_v54  ;;  %v3095_v56 = vpop.f32.mrb[7].mxu1  ;;  %v761_v21 = vmul.f32 %v3090_v53, %v3048_v12  ;;  %v809_v26 = vmul.f32 %v3090_v53, %v3056_v20  ;;  %v833_v31 = vmul.f32 %v3090_v53, %v3060_v24  ;;  %v785_v34 = vmul.f32 %v3090_v53, %v3052_v16 }
 0x381   :  { %v760_v36 = vmul.f32 %v3095_v56, %v3048_v12  ;;  %v784_v38 = vmul.f32 %v3095_v56, %v3052_v16  ;;  %v808_v40 = vmul.f32 %v3095_v56, %v3056_v20  ;;  %v832_v45 = vmul.f32 %v3095_v56, %v3060_v24 }
 0x382   :  { %v777_v25 = vsel %vm642_vm8, %v761_v21, 0.0  ;;  %v825_v30 = vsel %vm642_vm8, %v809_v26, 0.0  ;;  %v849_v35 = vsel %vm642_vm8, %v833_v31, 0.0  ;;  %v801_v37 = vsel %vm642_vm8, %v785_v34, 0.0 }
 0x383   :  { %862 = vadd.xlane.f32.xlu1 %v861_v57  ;;  %v774_v39 = vsel %vm642_vm8, %v760_v36, 0.0  ;;  %v798_v41 = vsel %vm642_vm8, %v784_v38, 0.0  ;;  %v822_v44 = vsel %vm642_vm8, %v808_v40, 0.0  ;;  %v857_v47 = vmul.f32 %v3090_v53, %v3064_v28  ;;  %v1176_v57 = vld [vmem:[#allocation12] sm:$0xff] }
 0x384   :  { %796 = vadd.xlane.f32.xlu0 %v795_v59  ;;  %v846_v48 = vsel %vm642_vm8, %v832_v45, 0.0  ;;  %v856_v49 = vmul.f32 %v3095_v56, %v3064_v28  ;;  %v881_v50 = vmul.f32 %v3090_v53, %v3068_v32  ;;  %v880_v52 = vmul.f32 %v3095_v56, %v3068_v32  ;;  %v1179_v53 = vld [vmem:[#allocation12 + $0x18] sm:$0xff] }
 0x385   :  { %v873_v43 = vsel %vm642_vm8, %v857_v47, 0.0  ;;  %v2206_v59 = vpack.c.bf16 %v1177_v58, %v1176_v57 }
 0x386   :  { %v870_v51 = vsel %vm642_vm8, %v856_v49, 0.0  ;;  %v897_v54 = vsel %vm642_vm8, %v881_v50, 0.0  ;;  %v894_v55 = vsel %vm642_vm8, %v880_v52, 0.0 }
 0x387   :  { %886 = vadd.xlane.f32.xlu1 %v885_v61  ;;  %2207 = vmatprep.subr.bf16.mxu1 %v2206_v59  ;;  %v2210_v61 = vpack.c.bf16 %v1179_v53, %v1178_v60 }
 0x388   :  { %820 = vadd.xlane.f32.xlu0 %v819_v63  ;;  %2209 = vmatpush3.bf16.msra.mxu1 %v2206_v59 }
 0x389   :  { %2211 = vmatprep.subr.bf16.mxu1 %v2210_v61 }
 0x38b   :  { %859 = vadd.xlane.f32.xlu1 %v858_v3 }
 0x38c   :  { %844 = vadd.xlane.f32.xlu0 %v843_v5  ;;  %2213 = vmatpush3.bf16.msra.mxu1 %v2210_v61 }
 0x38f   :  { %883 = vadd.xlane.f32.xlu1 %v882_v7 }
 0x390   :  { %769 = vadd.xlane.f32.xlu0 %v768_v9 }
 0x393   :  { %772 = vadd.xlane.f32.xlu1 %v771_v11 }
 0x394   :  { %817 = vadd.xlane.f32.xlu0 %v816_v14 }
 0x397   :  { %868 = vadd.xlane.f32.xlu1 %v867_v17 }
 0x398   :  { %841 = vadd.xlane.f32.xlu0 %v840_v19 }
 0x39b   :  { %793 = vadd.xlane.f32.xlu1 %v792_v22 }
 0x39c   :  { %778 = vadd.xlane.f32.xlu0 %v777_v25 }
 0x39f   :  { %865 = vadd.xlane.f32.xlu1 %v864_v27 }
 0x3a0   :  { %826 = vadd.xlane.f32.xlu0 %v825_v30 }
 0x3a3   :  { %889 = vadd.xlane.f32.xlu1 %v888_v33 }
 0x3a4   :  { %850 = vadd.xlane.f32.xlu0 %v849_v35 }
 0x3a7   :  { %802 = vadd.xlane.f32.xlu1 %v801_v37 }
 0x3a8   :  { %775 = vadd.xlane.f32.xlu0 %v774_v39 }
 0x3ab   :  { %799 = vadd.xlane.f32.xlu1 %v798_v41 }
 0x3ac   :  { %823 = vadd.xlane.f32.xlu0 %v822_v44 }
 0x3af   :  { %892 = vadd.xlane.f32.xlu1 %v891_v46 }
 0x3b0   :  { %847 = vadd.xlane.f32.xlu0 %v846_v48 }
 0x3b3   :  { %874 = vadd.xlane.f32.xlu1 %v873_v43 }
 0x3b4   :  { %871 = vadd.xlane.f32.xlu0 %v870_v51 }
 0x3b7   :  { %898 = vadd.xlane.f32.xlu1 %v897_v54 }
 0x3b8   :  { %895 = vadd.xlane.f32.xlu0 %v894_v55 }
 0x400   :  { %v767_v62 = vpop.xlane.xlu1 %766 }
 0x401   :  { %v764_v63 = vpop.xlane.xlu0 %763 }
 0x404   :  { %v791_v56 = vpop.xlane.xlu1 %790 }
 0x405   :  { %v788_v0 = vpop.xlane.xlu0 %787  ;;  %v901_v6 = vmax.f32 %v767_v62, %v791_v56 }
 0x406   :  { %v900_v15 = vmax.f32 %v764_v63, %v788_v0 }
 0x408   :  { %v815_v3 = vpop.xlane.xlu1 %814 }
 0x409   :  { %v812_v4 = vpop.xlane.xlu0 %811  ;;  %v907_v8 = vmax.f32 %v901_v6, %v815_v3 }
 0x40a   :  { %v906_v19 = vmax.f32 %v900_v15, %v812_v4 }
 0x40c   :  { %v839_v5 = vpop.xlane.xlu1 %838 }
 0x40d   :  { %v836_v7 = vpop.xlane.xlu0 %835  ;;  %v913_v10 = vmax.f32 %v907_v8, %v839_v5 }
 0x40e   :  { %v912_v27 = vmax.f32 %v906_v19, %v836_v7 }
 0x410   :  { %v863_v9 = vpop.xlane.xlu1 %862 }
 0x411   :  { %v3168_v11 = vpop.xlane.xlu0 %796  ;;  %v919_v13 = vmax.f32 %v913_v10, %v863_v9 }
 0x414   :  { %v887_v14 = vpop.xlane.xlu1 %886 }
 0x415   :  { %v925_v17 = vmax.f32 %v919_v13, %v887_v14  ;;  %v3170_v18 = vpop.xlane.xlu0 %820 }
 0x417   :  { %v931_v21 = vsub.f32 %v767_v62, %v925_v17  ;;  %v949_v22 = vsub.f32 %v791_v56, %v925_v17  ;;  %v967_v23 = vsub.f32 %v815_v3, %v925_v17  ;;  %v985_v25 = vsub.f32 %v839_v5, %v925_v17 }
 0x418   :  { %v860_v26 = vpop.xlane.xlu1 %859  ;;  %v1003_v31 = vsub.f32 %v863_v9, %v925_v17  ;;  %v1021_v35 = vsub.f32 %v887_v14, %v925_v17 }
 0x419   :  { %v938_v29 = vmul.f32 1.442695, %v931_v21  ;;  %v956_v30 = vmul.f32 1.442695, %v949_v22  ;;  %v3172_v33 = vpop.xlane.xlu0 %844  ;;  %v974_v34 = vmul.f32 1.442695, %v967_v23  ;;  %v918_v36 = vmax.f32 %v912_v27, %v860_v26 }
 0x41a   :  { %v992_v37 = vmul.f32 1.442695, %v985_v25  ;;  %v1010_v39 = vmul.f32 1.442695, %v1003_v31  ;;  %v1028_v42 = vmul.f32 1.442695, %v1021_v35 }
 0x41b   :  { %2278 = vpow2.f32 %v938_v29 }
 0x41c   :  { %2280 = vpow2.f32 %v956_v30  ;;  %v884_v38 = vpop.xlane.xlu1 %883 }
 0x41d   :  { %v924_v40 = vmax.f32 %v918_v36, %v884_v38  ;;  %v3174_v41 = vpop.xlane.xlu0 %769  ;;  %2282 = vpow2.f32 %v974_v34 }
 0x41e   :  { %2284 = vpow2.f32 %v992_v37 }
 0x41f   :  { %v930_v44 = vsub.f32 %v764_v63, %v924_v40  ;;  %v948_v45 = vsub.f32 %v788_v0, %v924_v40  ;;  %v966_v46 = vsub.f32 %v812_v4, %v924_v40  ;;  %v984_v47 = vsub.f32 %v836_v7, %v924_v40 }
 0x420   :  { %v3176_v48 = vpop.xlane.xlu1 %772  ;;  %2286 = vpow2.f32 %v1010_v39  ;;  %v1002_v52 = vsub.f32 %v860_v26, %v924_v40  ;;  %v1020_v53 = vsub.f32 %v884_v38, %v924_v40 }
 0x421   :  { %v936_v49 = vmul.f32 1.442695, %v930_v44  ;;  %v954_v43 = vmul.f32 1.442695, %v948_v45  ;;  %v818_v50 = vpop.xlane.xlu0 %817  ;;  %2288 = vpow2.f32 %v1028_v42  ;;  %v972_v51 = vmul.f32 1.442695, %v966_v46 }
 0x422   :  { %v990_v54 = vmul.f32 1.442695, %v984_v47  ;;  %v1008_v60 = vmul.f32 1.442695, %v1002_v52  ;;  %v1026_v5 = vmul.f32 1.442695, %v1020_v53  ;;  %v903_v21 = vmax.f32 %v3176_v48, %v3168_v11 }
 0x423   :  { %2290 = vpow2.f32 %v936_v49 }
 0x424   :  { %2292 = vpow2.f32 %v954_v43  ;;  %v3178_v55 = vpop.xlane.xlu1 %868  ;;  %v909_v35 = vmax.f32 %v903_v21, %v3170_v18 }
 0x425   :  { %v3180_v57 = vpop.eup %2278  ;;  %v842_v58 = vpop.xlane.xlu0 %841  ;;  %2294 = vpow2.f32 %v972_v51 }
 0x426   :  { %v3182_v59 = vpop.eup %2280  ;;  %2296 = vpow2.f32 %v990_v54  ;;  %v915_v52 = vmax.f32 %v909_v35, %v3172_v33 }
 0x427   :  { %v1039_v61 = vadd.f32 %v3182_v59, %v3180_v57  ;;  %v3186_v62 = vpop.eup %2282  ;;  %2298 = vpow2.f32 %v1008_v60 }
 0x428   :  { %v794_v63 = vpop.xlane.xlu1 %793  ;;  %v3192_v4 = vpop.eup %2284  ;;  %2300 = vpow2.f32 %v1026_v5  ;;  %v921_v5 = vmax.f32 %v915_v52, %v3178_v55 }
 0x429   :  { %v1045_v56 = vadd.f32 %v3186_v62, %v1039_v61  ;;  %v902_v0 = vmax.f32 %v3174_v41, %v794_v63  ;;  %v3190_v3 = vpop.xlane.xlu0 %778 }
 0x42a   :  { %v3194_v6 = vpop.eup %2286 }
 0x42b   :  { %v1051_v7 = vadd.f32 %v3192_v4, %v1045_v56  ;;  %v908_v8 = vmax.f32 %v902_v0, %v818_v50  ;;  %v3197_v9 = vpop.eup %2288 }
 0x42c   :  { %v866_v10 = vpop.xlane.xlu1 %865 }
 0x42d   :  { %v3199_v13 = vpop.eup %2290  ;;  %v1057_v14 = vadd.f32 %v3194_v6, %v1051_v7  ;;  %v914_v15 = vmax.f32 %v908_v8, %v842_v58  ;;  %v3202_v17 = vpop.xlane.xlu0 %826 }
 0x42e   :  { %v3204_v19 = vpop.eup %2292 }
 0x42f   :  { %v1063_v22 = vadd.f32 %v3197_v9, %v1057_v14  ;;  %v1038_v23 = vadd.f32 %v3204_v19, %v3199_v13  ;;  %v920_v25 = vmax.f32 %v914_v15, %v866_v10  ;;  %v3211_v26 = vpop.eup %2294 }
 0x430   :  { %v890_v27 = vpop.xlane.xlu1 %889  ;;  %v3216_v34 = vpop.eup %2296 }
 0x431   :  { %2302 = vrcp.f32 %v1063_v22  ;;  %v1044_v29 = vadd.f32 %v3211_v26, %v1038_v23  ;;  %v926_v30 = vmax.f32 %v920_v25, %v890_v27  ;;  %v3214_v31 = vpop.xlane.xlu0 %850  ;;  %v3221_v40 = vpop.eup %2298 }
 0x432   :  { %v3229_v54 = vpop.eup %2300 }
 0x433   :  { %v1050_v36 = vadd.f32 %v3216_v34, %v1044_v29  ;;  %v932_v37 = vsub.f32 %v3174_v41, %v926_v30  ;;  %v950_v38 = vsub.f32 %v794_v63, %v926_v30  ;;  %v968_v39 = vsub.f32 %v818_v50, %v926_v30 }
 0x434   :  { %v986_v42 = vsub.f32 %v842_v58, %v926_v30  ;;  %v3223_v44 = vpop.xlane.xlu1 %802  ;;  %v1004_v51 = vsub.f32 %v866_v10, %v926_v30  ;;  %v1022_v50 = vsub.f32 %v890_v27, %v926_v30 }
 0x435   :  { %v1056_v45 = vadd.f32 %v3221_v40, %v1050_v36  ;;  %v940_v46 = vmul.f32 1.442695, %v932_v37  ;;  %v958_v47 = vmul.f32 1.442695, %v950_v38  ;;  %v3226_v49 = vpop.xlane.xlu0 %775  ;;  %v976_v43 = vmul.f32 1.442695, %v968_v39 }
 0x436   :  { %v994_v41 = vmul.f32 1.442695, %v986_v42  ;;  %v905_v58 = vmax.f32 %v3190_v3, %v3223_v44  ;;  %v1012_v56 = vmul.f32 1.442695, %v1004_v51  ;;  %v1030_v7 = vmul.f32 1.442695, %v1022_v50 }
 0x437   :  { %2304 = vpow2.f32 %v940_v46  ;;  %v1062_v53 = vadd.f32 %v3229_v54, %v1056_v45 }
 0x438   :  { %2306 = vpow2.f32 %v958_v47  ;;  %v3233_v60 = vpop.xlane.xlu1 %799  ;;  %v911_v8 = vmax.f32 %v905_v58, %v3202_v17 }
 0x439   :  { %v904_v61 = vmax.f32 %v3226_v49, %v3233_v60  ;;  %v3238_v63 = vpop.xlane.xlu0 %823  ;;  %2308 = vpow2.f32 %v976_v43 }
 0x43a   :  { %2310 = vpow2.f32 %v994_v41  ;;  %v917_v36 = vmax.f32 %v911_v8, %v3214_v31 }
 0x43b   :  { %v3240_v0 = vpop.eup %2302  ;;  %2312 = vrcp.f32 %v1062_v53  ;;  %v910_v14 = vmax.f32 %v904_v61, %v3238_v63 }
 0x43c   :  { %v893_v10 = vpop.xlane.xlu1 %892  ;;  %2314 = vpow2.f32 %v1012_v56  ;;  %v3249_v22 = vmul.f32 %v3240_v0, %v3180_v57  ;;  %v3253_v23 = vmul.f32 %v3240_v0, %v3182_v59  ;;  %v3283_v50 = vmul.f32 %v3240_v0, %v3192_v4 }
 0x43d   :  { %v927_v15 = vmax.f32 %v921_v5, %v893_v10  ;;  %v3245_v21 = vpop.xlane.xlu0 %847  ;;  %2316 = vpow2.f32 %v1030_v7  ;;  %v3290_v56 = vmul.f32 %v3240_v0, %v3194_v6 }
 0x43e   :  { %v916_v59 = vmax.f32 %v910_v14, %v3245_v21  ;;  %v1117_v45 = vmul.f32 %v3253_v23, %v3052_v16 }
 0x43f   :  { %v933_v25 = vsub.f32 %v3176_v48, %v927_v15  ;;  %v951_v27 = vsub.f32 %v3168_v11, %v927_v15  ;;  %v969_v29 = vsub.f32 %v3170_v18, %v927_v15  ;;  %v987_v30 = vsub.f32 %v3172_v33, %v927_v15 }
 0x440   :  { %v1005_v35 = vsub.f32 %v3178_v55, %v927_v15  ;;  %v875_v37 = vpop.xlane.xlu1 %874  ;;  %v3268_v11 = vmul.f32 %v3240_v0, %v3186_v62  ;;  %v1023_v48 = vsub.f32 %v893_v10, %v927_v15  ;;  %v1111_v55 = vmul.f32 %v3249_v22, %v3048_v12 }
 0x441   :  { %v3261_v57 = vpop.eup %2304  ;;  %v942_v38 = vmul.f32 1.442695, %v933_v25  ;;  %v960_v39 = vmul.f32 1.442695, %v951_v27  ;;  %v3264_v42 = vpop.xlane.xlu0 %871  ;;  %v978_v33 = vmul.f32 1.442695, %v969_v29  ;;  %v923_v43 = vmax.f32 %v917_v36, %v875_v37 }
 0x442   :  { %v3270_v18 = vpop.eup %2306  ;;  %v996_v47 = vmul.f32 1.442695, %v987_v30  ;;  %v1014_v62 = vmul.f32 1.442695, %v1005_v35  ;;  %v922_v52 = vmax.f32 %v916_v59, %v3264_v42  ;;  %v1129_v5 = vmul.f32 %v3268_v11, %v3056_v20 }
 0x443   :  { %v1040_v46 = vadd.f32 %v3270_v18, %v3261_v57  ;;  %2318 = vpow2.f32 %v942_v38  ;;  %v3278_v51 = vpop.eup %2308  ;;  %v1032_v8 = vmul.f32 1.442695, %v1023_v48  ;;  %v1123_v4 = vadd.f32 %v1117_v45, %v1111_v55 }
 0x444   :  { %2320 = vpow2.f32 %v960_v39  ;;  %v899_v41 = vpop.xlane.xlu1 %898  ;;  %v3294_v7 = vpop.eup %2310  ;;  %v1141_v35 = vmul.f32 %v3283_v50, %v3060_v24 }
 0x445   :  { %v1046_v58 = vadd.f32 %v3278_v51, %v1040_v46  ;;  %v929_v53 = vmax.f32 %v923_v43, %v899_v41  ;;  %v3286_v61 = vpop.xlane.xlu0 %895  ;;  %2322 = vpow2.f32 %v978_v33  ;;  %v2313_v14 = vpop.eup %2312 }
 0x446   :  { %v3297_v10 = vmax.f32 %v922_v52, %v3286_v61  ;;  %2324 = vpow2.f32 %v996_v47  ;;  %v3302_v27 = vpop.eup %2314  ;;  %v3314_v48 = vmul.f32 %v2313_v14, %v3199_v13  ;;  %v3320_v55 = vmul.f32 %v2313_v14, %v3204_v19 }
 0x447   :  { %v1052_v15 = vadd.f32 %v3294_v7, %v1046_v58  ;;  %v935_v25 = vsub.f32 %v3190_v3, %v929_v53  ;;  %v953_v6 = vsub.f32 %v3223_v44, %v929_v53  ;;  %2326 = vpow2.f32 %v1014_v62  ;;  %v3309_v33 = vpop.eup %2316 }
 0x448   :  { %v971_v29 = vsub.f32 %v3202_v17, %v929_v53  ;;  %v989_v30 = vsub.f32 %v3214_v31, %v929_v53  ;;  %v1007_v59 = vsub.f32 %v875_v37, %v929_v53  ;;  %2328 = vpow2.f32 %v1032_v8 }
 0x449   :  { %v1058_v36 = vadd.f32 %v3302_v27, %v1052_v15  ;;  %v946_v38 = vmul.f32 1.442695, %v935_v25  ;;  %v964_v39 = vmul.f32 1.442695, %v953_v6  ;;  %v934_v44 = vsub.f32 %v3226_v49, %v3297_v10 }
 0x44a   :  { %v982_v3 = vmul.f32 1.442695, %v971_v29  ;;  %v952_v31 = vsub.f32 %v3233_v60, %v3297_v10  ;;  %v1000_v37 = vmul.f32 1.442695, %v989_v30  ;;  %v1025_v45 = vsub.f32 %v899_v41, %v929_v53 }
 0x44b   :  { %v1064_v17 = vadd.f32 %v3309_v33, %v1058_v36  ;;  %2330 = vpow2.f32 %v946_v38  ;;  %v3323_v46 = vmul.f32 %v2313_v14, %v3211_v26  ;;  %v1018_v13 = vmul.f32 1.442695, %v1007_v59 }
 0x44c   :  { %2332 = vpow2.f32 %v964_v39  ;;  %v970_v49 = vsub.f32 %v3238_v63, %v3297_v10  ;;  %v3330_v43 = vmul.f32 %v2313_v14, %v3216_v34  ;;  %v944_v19 = vmul.f32 1.442695, %v934_v44 }
 0x44d   :  { %v3325_v47 = vpop.eup %2318  ;;  %2334 = vrcp.f32 %v1064_v17  ;;  %v3335_v62 = vmul.f32 %v2313_v14, %v3221_v40  ;;  %v1110_v26 = vmul.f32 %v3314_v48, %v3048_v12  ;;  %v962_v41 = vmul.f32 1.442695, %v952_v31 }
 0x44e   :  { %v3332_v60 = vpop.eup %2320  ;;  %2336 = vpow2.f32 %v982_v3  ;;  %v988_v63 = vsub.f32 %v3245_v21, %v3297_v10  ;;  %v1006_v34 = vsub.f32 %v3264_v42, %v3297_v10  ;;  %v1036_v53 = vmul.f32 1.442695, %v1025_v45 }
 0x44f   :  { %v1041_v52 = vadd.f32 %v3332_v60, %v3325_v47  ;;  %v3345_v58 = vpop.eup %2322  ;;  %2338 = vpow2.f32 %v1000_v37  ;;  %v3348_v40 = vmul.f32 %v2313_v14, %v3229_v54  ;;  %v1116_v8 = vmul.f32 %v3320_v55, %v3052_v16 }
 0x450   :  { %v3352_v15 = vpop.eup %2324  ;;  %2340 = vpow2.f32 %v1018_v13  ;;  %v980_v6 = vmul.f32 1.442695, %v970_v49  ;;  %v1024_v21 = vsub.f32 %v3286_v61, %v3297_v10  ;;  %v1128_v54 = vmul.f32 %v3323_v46, %v3056_v20 }
 0x451   :  { %v1047_v25 = vadd.f32 %v3345_v58, %v1041_v52  ;;  %v3357_v42 = vpop.eup %2326  ;;  %2342 = vpow2.f32 %v944_v19  ;;  %v1122_v29 = vadd.f32 %v1116_v8, %v1110_v26  ;;  %v1135_v14 = vadd.f32 %v1129_v5, %v1123_v4 }
 0x452   :  { %2344 = vpow2.f32 %v962_v41  ;;  %v998_v36 = vmul.f32 1.442695, %v988_v63  ;;  %v1016_v38 = vmul.f32 1.442695, %v1006_v34  ;;  %v3362_v39 = vpop.eup %2328  ;;  %v1140_v61 = vmul.f32 %v3330_v43, %v3060_v24 }
 0x453   :  { %v1053_v30 = vadd.f32 %v3352_v15, %v1047_v25  ;;  %2346 = vpow2.f32 %v1036_v53  ;;  %v1134_v59 = vadd.f32 %v1128_v54, %v1122_v29  ;;  %v1147_v10 = vadd.f32 %v1141_v35, %v1135_v14 }
 0x454   :  { %v3370_v44 = vmul.f32 %v3240_v0, %v3197_v9  ;;  %2348 = vpow2.f32 %v980_v6  ;;  %v1153_v4 = vmul.f32 %v3290_v56, %v3064_v28  ;;  %v1034_v31 = vmul.f32 1.442695, %v1024_v21 }
 0x455   :  { %v3366_v3 = vpop.eup %2330  ;;  %v1059_v5 = vadd.f32 %v3357_v42, %v1053_v30  ;;  %v1146_v37 = vadd.f32 %v1140_v61, %v1134_v59  ;;  %v1152_v45 = vmul.f32 %v3335_v62, %v3064_v28  ;;  %v1164_v35 = vmul.f32 %v3348_v40, %v3068_v32 }
 0x456   :  { %v3375_v17 = vpop.eup %2332  ;;  %2350 = vpow2.f32 %v998_v36  ;;  %v1159_v49 = vadd.f32 %v1153_v4, %v1147_v10  ;;  %v1165_v63 = vmul.f32 %v3370_v44, %v3068_v32 }
 0x457   :  { %v2335_v13 = vpop.eup %2334  ;;  %v1065_v9 = vadd.f32 %v3362_v39, %v1059_v5  ;;  %v1043_v0 = vadd.f32 %v3375_v17, %v3366_v3  ;;  %2352 = vpow2.f32 %v1016_v38  ;;  %v1158_v26 = vadd.f32 %v1152_v45, %v1146_v37 }
 0x458   :  { %v3384_v19 = vpop.eup %2336  ;;  %v3387_v52 = vmul.f32 %v2335_v13, %v3261_v57  ;;  %v3390_v41 = vmul.f32 %v2335_v13, %v3270_v18  ;;  %v3396_v53 = vmul.f32 %v2335_v13, %v3278_v51  ;;  %v1171_v21 = vadd.f32 %v1165_v63, %v1159_v49 }
 0x459   :  { %2354 = vrcp.f32 %v1065_v9  ;;  %v1049_v34 = vadd.f32 %v3384_v19, %v1043_v0  ;;  %v3398_v8 = vpop.eup %2338  ;;  %v1170_v25 = vadd.f32 %v1164_v35, %v1158_v26  ;;  %v3406_v29 = vmul.f32 %v2335_v13, %v3294_v7 }
 0x45a   :  { %2356 = vpow2.f32 %v1034_v31  ;;  %v1112_v57 = vmul.f32 %v3387_v52, %v3048_v12  ;;  %v3402_v6 = vpop.eup %2340  ;;  %v1118_v54 = vmul.f32 %v3390_v41, %v3052_v16  ;;  %v3414_v36 = vmul.f32 %v2335_v13, %v3302_v27 }
 0x45b   :  { %v1055_v18 = vadd.f32 %v3398_v8, %v1049_v34  ;;  %v2343_v51 = vpop.eup %2342  ;;  %2082 = vmatprep.mubr.msk.f32.mxu1 %vm642_vm8, %v1170_v25  ;;  %v1130_v59 = vmul.f32 %v3396_v53, %v3056_v20  ;;  %v3422_v4 = vmul.f32 %v2335_v13, %v3309_v33  ;;  %v1142_v37 = vmul.f32 %v3406_v29, %v3060_v24 }
 0x45c   :  { %v2345_v14 = vpop.eup %2344  ;;  %2083 = vmatmul.mubr.msk.f32.vlgmr.msra.gmra.mrb[8].mxu1 %vm642_vm8, %v1171_v21  ;;  %v1124_v38 = vadd.f32 %v1118_v54, %v1112_v57  ;;  %v1154_v9 = vmul.f32 %v3414_v36, %v3064_v28 }
 0x45d   :  { %v1061_v30 = vadd.f32 %v3402_v6, %v1055_v18  ;;  %v3418_v7 = vpop.eup %2346  ;;  %v1042_v61 = vadd.f32 %v2345_v14, %v2343_v51  ;;  %v1166_v34 = vmul.f32 %v3422_v4, %v3068_v32 }
 0x45e   :  { %v2349_v10 = vpop.eup %2348  ;;  %v1136_v31 = vadd.f32 %v1130_v59, %v1124_v38 }
 0x45f   :  { %v1067_v5 = vadd.f32 %v3418_v7, %v1061_v30  ;;  %v1048_v45 = vadd.f32 %v2349_v10, %v1042_v61 }
 0x460   :  { %v2351_v27 = vpop.eup %2350  ;;  %v1148_v35 = vadd.f32 %v1142_v37, %v1136_v31 }
 0x461   :  { %2358 = vrcp.f32 %v1067_v5  ;;  %v2353_v0 = vpop.eup %2352  ;;  %v1054_v49 = vadd.f32 %v2351_v27, %v1048_v45 }
 0x462   :  { %v1160_v63 = vadd.f32 %v1154_v9, %v1148_v35 }
 0x463   :  { %v2355_v26 = vpop.eup %2354  ;;  %v1060_v13 = vadd.f32 %v2353_v0, %v1054_v49 }
 0x464   :  { %v2357_v33 = vpop.eup %2356  ;;  %v3431_v25 = vmul.f32 %v2355_v26, %v3325_v47  ;;  %v3434_v57 = vmul.f32 %v2355_v26, %v3332_v60  ;;  %v3437_v18 = vmul.f32 %v2355_v26, %v3345_v58  ;;  %v1172_v21 = vadd.f32 %v1166_v34, %v1160_v63 }
 0x465   :  { %v1066_v54 = vadd.f32 %v2357_v33, %v1060_v13  ;;  %v3440_v30 = vmul.f32 %v2355_v26, %v3352_v15  ;;  %v3448_v47 = vmul.f32 %v2355_v26, %v3357_v42  ;;  %v3453_v61 = vmul.f32 %v2355_v26, %v3362_v39 }
 0x466   :  { %v1113_v38 = vmul.f32 %v3431_v25, %v3048_v12  ;;  %v1119_v59 = vmul.f32 %v3434_v57, %v3052_v16  ;;  %2085 = vmatprep.mubr.msk.f32.mxu1 %vm642_vm8, %v1172_v21  ;;  %v1131_v58 = vmul.f32 %v3437_v18, %v3056_v20 }
 0x467   :  { %2360 = vrcp.f32 %v1066_v54  ;;  %v1143_v5 = vmul.f32 %v3440_v30, %v3060_v24  ;;  %v1155_v45 = vmul.f32 %v3448_v47, %v3064_v28  ;;  %v1167_v9 = vmul.f32 %v3453_v61, %v3068_v32 }
 0x468   :  { %v1125_v60 = vadd.f32 %v1119_v59, %v1113_v38 }
 0x46a   :  { %v1137_v15 = vadd.f32 %v1131_v58, %v1125_v60 }
 0x46b   :  { %v2359_v31 = vpop.eup %2358 }
 0x46c   :  { %v1149_v37 = vadd.f32 %v1143_v5, %v1137_v15  ;;  %v3460_v35 = vmul.f32 %v2359_v31, %v3366_v3  ;;  %v3463_v42 = vmul.f32 %v2359_v31, %v3375_v17  ;;  %v3468_v49 = vmul.f32 %v2359_v31, %v3384_v19 }
 0x46d   :  { %v3476_v17 = vmul.f32 %v2359_v31, %v3398_v8  ;;  %v3487_v5 = vmul.f32 %v2359_v31, %v3402_v6 }
 0x46e   :  { %v1161_v39 = vadd.f32 %v1155_v45, %v1149_v37  ;;  %v1115_v26 = vmul.f32 %v3460_v35, %v3048_v12  ;;  %v1121_v63 = vmul.f32 %v3463_v42, %v3052_v16  ;;  %v1133_v21 = vmul.f32 %v3468_v49, %v3056_v20 }
 0x46f   :  { %v1145_v8 = vmul.f32 %v3476_v17, %v3060_v24  ;;  %v1157_v6 = vmul.f32 %v3487_v5, %v3064_v28 }
 0x470   :  { %v1173_v34 = vadd.f32 %v1167_v9, %v1161_v39  ;;  %v1127_v13 = vadd.f32 %v1121_v63, %v1115_v26  ;;  %v3500_v39 = vmul.f32 %v2359_v31, %v3418_v7  ;;  %v1371_v7 = vld [vmem:[#allocation14] sm:$0xff]  ;;  %v1372_v31 = vld [vmem:[#allocation14 + $0x8] sm:$0xff] }
 0x471   :  { %v2361_v3 = vpop.eup %2360 }
 0x472   :  { %2086 = vmatmul.mubr.msk.f32.gmra.mrb[10].mxu1 %vm642_vm8, %v1173_v34  ;;  %v1078_v54 = vmul.f32 %v2361_v3, %v2343_v51  ;;  %v1084_v19 = vmul.f32 %v2361_v3, %v2345_v14  ;;  %v3480_v38 = vmul.f32 %v2361_v3, %v2349_v10  ;;  %v1139_v59 = vadd.f32 %v1133_v21, %v1127_v13 }
 0x473   :  { %v3482_v60 = vmul.f32 %v2361_v3, %v2351_v27  ;;  %v3491_v37 = vmul.f32 %v2361_v3, %v2353_v0  ;;  %v3495_v10 = vmul.f32 %v2361_v3, %v2357_v33  ;;  %v1169_v13 = vmul.f32 %v3500_v39, %v3068_v32 }
 0x474   :  { %v1114_v58 = vmul.f32 %v1078_v54, %v3048_v12  ;;  %v1120_v15 = vmul.f32 %v1084_v19, %v3052_v16  ;;  %v1132_v51 = vmul.f32 %v3480_v38, %v3056_v20  ;;  %v1151_v14 = vadd.f32 %v1145_v8, %v1139_v59  ;;  %v1373_v59 = vld [vmem:[#allocation14 + $0x10] sm:$0xff] }
 0x475   :  { %v1144_v9 = vmul.f32 %v3482_v60, %v3060_v24  ;;  %v1156_v0 = vmul.f32 %v3491_v37, %v3064_v28  ;;  %v1168_v33 = vmul.f32 %v3495_v10, %v3068_v32 }
 0x476   :  { %v1126_v45 = vadd.f32 %v1120_v15, %v1114_v58  ;;  %v1163_v63 = vadd.f32 %v1157_v6, %v1151_v14  ;;  %v2214_v58 = vpack.c.bf16 %v1372_v31, %v1371_v7  ;;  %v1374_v15 = vld [vmem:[#allocation14 + $0x18] sm:$0xff] }
 0x477   :  { %v2218_v8 = vpack.c.bf16 %v1374_v15, %v1373_v59 }
 0x478   :  { %v1138_v27 = vadd.f32 %v1132_v51, %v1126_v45  ;;  %v1175_v21 = vadd.f32 %v1169_v13, %v1163_v63  ;;  %2215 = vmatprep.subr.bf16.mxu1 %v2214_v58 }
 0x479   :  { %2217 = vmatpush3.bf16.msra.mxu1 %v2214_v58 }
 0x47a   :  { %v1150_v26 = vadd.f32 %v1144_v9, %v1138_v27  ;;  %2219 = vmatprep.subr.bf16.mxu1 %v2218_v8 }
 0x47c   :  { %v1162_v34 = vadd.f32 %v1156_v0, %v1150_v26 }
 0x47d   :  { %2221 = vmatpush3.bf16.msra.mxu1 %v2218_v8 }
 0x47e   :  { %v1174_v3 = vadd.f32 %v1168_v33, %v1162_v34  ;;  %2222 = vmatprep.subr.bf16.mxu1 %v2653_v1 }
 0x480   :  { %2088 = vmatprep.mubr.msk.f32.mxu1 %vm642_vm8, %v1174_v3 }
 0x481   :  { %2089 = vmatmul.mubr.msk.f32.gmra.mrb[12].mxu1 %vm642_vm8, %v1175_v21 }
 0x52f   :  { %v2084_v45 = vpop.f32.mrb[8].mxu1 }
 0x530   :  { %v1264_v51 = vpop.f32.mrb[9].mxu1  ;;  %v1294_v14 = vmax.f32 %v2084_v45, 0.0 }
 0x531   :  { %v1293_v27 = vmax.f32 %v1264_v51, 0.0 }
 0x532   :  { %v1300_v9 = vadd.f32 %v1294_v14, %v3052_v16 }
 0x533   :  { %v3515_v6 = vadd.f32 %v1293_v27, %v3048_v12 }
 0x534   :  { %v1312_v26 = vmul.f32 %v1300_v9, %v3253_v23  ;;  %v1311_v63 = vmul.f32 %v1300_v9, %v3320_v55  ;;  %v1313_v34 = vmul.f32 %v1300_v9, %v3390_v41  ;;  %v1314_v33 = vmul.f32 %v1300_v9, %v3434_v57 }
 0x535   :  { %v1306_v0 = vmul.f32 %v3515_v6, %v3249_v22  ;;  %v1305_v3 = vmul.f32 %v3515_v6, %v3314_v48  ;;  %v1307_v16 = vmul.f32 %v3515_v6, %v3387_v52  ;;  %v1308_v12 = vmul.f32 %v3515_v6, %v3431_v25 }
 0x536   :  { %v1309_v23 = vmul.f32 %v3515_v6, %v1078_v54  ;;  %v1315_v7 = vmul.f32 %v1300_v9, %v1084_v19  ;;  %v1310_v55 = vmul.f32 %v3515_v6, %v3460_v35  ;;  %v1316_v41 = vmul.f32 %v1300_v9, %v3463_v42 }
 0x537   :  { %v1318_v48 = vadd.f32 %v1312_v26, %v1306_v0  ;;  %v1317_v52 = vadd.f32 %v1311_v63, %v1305_v3  ;;  %v1319_v58 = vadd.f32 %v1313_v34, %v1307_v16  ;;  %v1320_v15 = vadd.f32 %v1314_v33, %v1308_v12  ;;  %v1485_v16 = vld [vmem:[#allocation15] sm:$0xff]  ;;  %v1486_v12 = vld [vmem:[#allocation15 + $0x8] sm:$0xff] }
 0x538   :  { %v1321_v8 = vadd.f32 %v1315_v7, %v1309_v23  ;;  %v1322_v19 = vadd.f32 %v1316_v41, %v1310_v55 }
 0x545   :  { %v2087_v13 = vpop.f32.mrb[10].mxu1 }
 0x546   :  { %v1296_v21 = vmax.f32 %v2087_v13, 0.0  ;;  %v1274_v22 = vpop.f32.mrb[11].mxu1 }
 0x547   :  { %v1295_v57 = vmax.f32 %v1274_v22, 0.0  ;;  %v2223_v22 = vpack.c.bf16 %v1486_v12, %v1485_v16  ;;  %v1666_v16 = vld [vmem:[%s3670_s17 + $0x58] sm:$0xff] }
 0x548   :  { %v1302_v31 = vadd.f32 %v1296_v21, %v3060_v24 }
 0x549   :  { %v1301_v59 = vadd.f32 %v1295_v57, %v3056_v20 }
 0x54a   :  { %v1336_v25 = vmul.f32 %v1302_v31, %v3283_v50  ;;  %v1335_v54 = vmul.f32 %v1302_v31, %v3330_v43  ;;  %v1337_v51 = vmul.f32 %v1302_v31, %v3406_v29  ;;  %v1338_v20 = vmul.f32 %v1302_v31, %v3440_v30 }
 0x54b   :  { %v1324_v45 = vmul.f32 %v1301_v59, %v3268_v11  ;;  %v1323_v35 = vmul.f32 %v1301_v59, %v3323_v46  ;;  %v1325_v42 = vmul.f32 %v1301_v59, %v3396_v53  ;;  %v1326_v24 = vmul.f32 %v1301_v59, %v3437_v18 }
 0x54c   :  { %v1327_v14 = vmul.f32 %v1301_v59, %v3480_v38  ;;  %v1328_v50 = vmul.f32 %v1301_v59, %v3468_v49  ;;  %v1339_v11 = vmul.f32 %v1302_v31, %v3482_v60  ;;  %v1340_v53 = vmul.f32 %v1302_v31, %v3476_v17 }
 0x54d   :  { %v1330_v27 = vadd.f32 %v1324_v45, %v1318_v48  ;;  %v1329_v43 = vadd.f32 %v1323_v35, %v1317_v52  ;;  %v1331_v9 = vadd.f32 %v1325_v42, %v1319_v58  ;;  %v1332_v26 = vadd.f32 %v1326_v24, %v1320_v15 }
 0x54e   :  { %v1333_v0 = vadd.f32 %v1327_v14, %v1321_v8  ;;  %v1334_v46 = vadd.f32 %v1328_v50, %v1322_v19  ;;  %v1570_v8 = vld [vmem:[#allocation18] sm:$0xff]  ;;  %v1571_v19 = vld [vmem:[#allocation18 + $0x8] sm:$0xff] }
 0x54f   :  { %v1341_v63 = vadd.f32 %v1335_v54, %v1329_v43  ;;  %v1342_v18 = vadd.f32 %v1336_v25, %v1330_v27  ;;  %v1343_v34 = vadd.f32 %v1337_v51, %v1331_v9  ;;  %v1344_v29 = vadd.f32 %v1338_v20, %v1332_v26  ;;  %v1572_v27 = vld [vmem:[#allocation18 + $0x10] sm:$0xff]  ;;  %v1573_v43 = vld [vmem:[#allocation18 + $0x18] sm:$0xff] }
 0x550   :  { %v1345_v33 = vadd.f32 %v1339_v11, %v1333_v0  ;;  %v1346_v30 = vadd.f32 %v1340_v53, %v1334_v46  ;;  %v2229_v42 = vpack.c.bf16 %v1571_v19, %v1570_v8  ;;  %v2232_v9 = vpack.c.bf16 %v1573_v43, %v1572_v27  ;;  %v1655_v26 = vld [vmem:[%s3670_s17] sm:$0xff]  ;;  %v1657_v0 = vld [vmem:[%s3670_s17 + $0x10] sm:$0xff]  ;;  %v1658_v46 = vld [vmem:[%s3670_s17 + $0x18] sm:$0xff] }
 0x551   :  { %v2238_v53 = vpack.c.bf16 %v1658_v46, %v1657_v0 }
 0x554   :  { %v2090_v13 = vpop.f32.mrb[12].mxu1 }
 0x555   :  { %v1298_v38 = vmax.f32 %v2090_v13, 0.0  ;;  %v1284_v3 = vpop.f32.mrb[13].mxu1  ;;  %v1663_v13 = vld [vmem:[%s3670_s17 + $0x40] sm:$0xff] }
 0x556   :  { %v1297_v49 = vmax.f32 %v1284_v3, 0.0 }
 0x557   :  { %v1304_v23 = vadd.f32 %v1298_v38, %v3068_v32  ;;  %v1664_v38 = vld [vmem:[%s3670_s17 + $0x48] sm:$0xff] }
 0x558   :  { %v1303_v21 = vadd.f32 %v1297_v49, %v3064_v28  ;;  %v2247_v3 = vpack.c.bf16 %v1664_v38, %v1663_v13  ;;  %v1665_v49 = vld [vmem:[%s3670_s17 + $0x50] sm:$0xff] }
 0x559   :  { %v1359_v60 = vmul.f32 %v1304_v23, %v3348_v40  ;;  %v1360_v17 = vmul.f32 %v1304_v23, %v3370_v44  ;;  %v1361_v31 = vmul.f32 %v1304_v23, %v3422_v4  ;;  %v1362_v48 = vmul.f32 %v1304_v23, %v3453_v61 }
 0x55a   :  { %v1348_v7 = vmul.f32 %v1303_v21, %v3290_v56  ;;  %v1347_v55 = vmul.f32 %v1303_v21, %v3335_v62  ;;  %v1349_v41 = vmul.f32 %v1303_v21, %v3414_v36  ;;  %v1350_v57 = vmul.f32 %v1303_v21, %v3448_v47 }
 0x55b   :  { %v1351_v32 = vmul.f32 %v1303_v21, %v3491_v37  ;;  %v1352_v28 = vmul.f32 %v1303_v21, %v3487_v5  ;;  %v1363_v56 = vmul.f32 %v1304_v23, %v3495_v10  ;;  %v1364_v36 = vmul.f32 %v1304_v23, %v3500_v39  ;;  %v1487_v5 = vld [vmem:[#allocation15 + $0x10] sm:$0xff]  ;;  %v1488_v37 = vld [vmem:[#allocation15 + $0x18] sm:$0xff] }
 0x55c   :  { %v1353_v40 = vadd.f32 %v1347_v55, %v1341_v63  ;;  %v1354_v59 = vadd.f32 %v1348_v7, %v1342_v18  ;;  %v1355_v44 = vadd.f32 %v1349_v41, %v1343_v34  ;;  %v1356_v52 = vadd.f32 %v1350_v57, %v1344_v29  ;;  %v1659_v63 = vld [vmem:[%s3670_s17 + $0x20] sm:$0xff]  ;;  %v1660_v18 = vld [vmem:[%s3670_s17 + $0x28] sm:$0xff]  ;;  %v1661_v29 = vld [vmem:[%s3670_s17 + $0x30] sm:$0xff] }
 0x55d   :  { %v1357_v58 = vadd.f32 %v1351_v32, %v1345_v33  ;;  %v1358_v62 = vadd.f32 %v1352_v28, %v1346_v30  ;;  %v2226_v10 = vpack.c.bf16 %v1488_v37, %v1487_v5  ;;  %v2241_v34 = vpack.c.bf16 %v1660_v18, %v1659_v63  ;;  %v1662_v33 = vld [vmem:[%s3670_s17 + $0x38] sm:$0xff]  ;;  %v1667_v23 = vld [vmem:[%s3670_s17 + $0x60] sm:$0xff]  ;;  %v1668_v21 = vld [vmem:[%s3670_s17 + $0x68] sm:$0xff] }
 0x55e   :  { %v1365_v15 = vadd.f32 %v1359_v60, %v1353_v40  ;;  %v1366_v47 = vadd.f32 %v1360_v17, %v1354_v59  ;;  %v1367_v25 = vadd.f32 %v1361_v31, %v1355_v44  ;;  %v1368_v4 = vadd.f32 %v1362_v48, %v1356_v52  ;;  %v1888_v17 = vld [vmem:[#allocation17] ss:$0 sm:$0xff]  ;;  %v1670_v31 = vld [vmem:[%s3670_s17 + $0x78] sm:$0xff]  ;;  %v1750_v44 = vld [vmem:[#allocation2] sm:$0x1] }
 0x55f   :  { %v1369_v54 = vadd.f32 %v1363_v56, %v1357_v58  ;;  %v1370_v61 = vadd.f32 %v1364_v36, %v1358_v62  ;;  %v2244_v30 = vpack.c.bf16 %v1662_v33, %v1661_v29  ;;  %v2250_v12 = vpack.c.bf16 %v1666_v16, %v1665_v49  ;;  %v1669_v57 = vld [vmem:[%s3670_s17 + $0x70] sm:$0xff]  ;;  %v1892_v58 = vld [vmem:[%s3671_s18] ss:$0 sm:$0xff]  ;;  %s2604_s18 = scalar_lea.vmem %s1839_s1, 16 }
 0x560   :  { %2099 = vmatprep.mubr.msk.f32.mxu1 %vm642_vm8, %v1365_v15  ;;  %v2253_v60 = vpack.c.bf16 %v1668_v21, %v1667_v23  ;;  %v2256_v48 = vpack.c.bf16 %v1670_v31, %v1669_v57  ;;  %v2657_v52 = vmov 0   ;;  %p2605_p4 = scmp.ne.s32.totalorder %s1839_s1, %s2604_s18  ;;  %p2610_p6 = scmp.lt.s32.totalorder %s2608_s26, %s2604_s18 }
 0x561   :  { %2100 = vmatmul.mubr.msk.f32.vlgmr.msra.gmra.mrb[14].mxu1 %vm642_vm8, %v1366_v47  ;;  %2277 = vset.pattern.permute.xlu0 %v2657_v52  ;;  %v1749_v47 = vld [vmem:[%s3672_s19] sm:$0x1] }
 0x562   :  { %2102 = vmatprep.mubr.msk.f32.mxu1 %vm642_vm8, %v1367_v25  ;;  %2224 = vmatpush3.bf16.msra.mxu1 %v2223_v22  ;;  %v1756_v25 = vlaneseq  ;;  %p2611_p7 = por %p2610_p6, %p2609_p5 }
 0x563   :  { %2225 = vmatprep.subr.bf16.mxu1 %v2653_v1  ;;  %1753 = vperm.xlu0 %2277, %v1750_v44  }
 0x564   :  { %p2612_p8 = pnand %p2611_p7, %p2605_p4 }
 0x565   :  { %2103 = vmatmul.mubr.msk.f32.gmra.mrb[16].mxu1 %vm642_vm8, %v1368_v4 }
 0x566   :  { %2105 = vmatprep.mubr.msk.f32.mxu1 %vm642_vm8, %v1369_v54  ;;  %2227 = vmatpush3.bf16.msra.mxu1 %v2226_v10 }
 0x567   :  { %2228 = vmatprep.subr.bf16.mxu1 %v2653_v1 }
 0x569   :  { %2106 = vmatmul.mubr.msk.f32.gmra.mrb[18].mxu1 %vm642_vm8, %v1370_v61 }
 0x56a   :  { %2116 = vmatprep.mubr.msk.f32.mxu1 %vm2654_vm0, %v2655_v2 }
 0x5e2   :  { %v1754_v54 = vpop.permute.xlu0 %1753 }
 0x634   :  { %v2101_v39 = vpop.f32.mrb[14].mxu1 }
 0x635   :  { %v1459_v45 = vpop.f32.mrb[15].mxu1 }
 0x636   :  { %v1483_v35 = vmax.f32 %v1459_v45, 0.0 }
 0x638   :  { %v1484_v24 = vadd.f32 %v1483_v35, %v3515_v6  ;;  %v2104_v51 = vpop.f32.mrb[16].mxu1  ;;  %v1656_v6 = vld [vmem:[%s3670_s17 + $0x8] sm:$0xff] }
 0x639   :  { %v1468_v20 = vpop.f32.mrb[17].mxu1  ;;  %v2235_v11 = vpack.c.bf16 %v1656_v6, %v1655_v26 }
 0x63a   :  { %2117 = vmatmul.mubr.msk.f32.vlgmr.msra.gmra.mrb[20].mxu1 %vm642_vm8, %v1484_v24 }
 0x63b   :  { %2230 = vmatpush3.bf16.msra.mxu1 %v2229_v42  ;;  %2127 = vmatprep.mubr.msk.f32.mxu1 %vm2654_vm0, %v2655_v2 }
 0x63c   :  { %v2107_v14 = vpop.f32.mrb[18].mxu1  ;;  %2231 = vmatprep.subr.bf16.mxu1 %v2653_v1  ;;  %2236 = vmatpush3.bf16.msra.mxu0 %v2235_v11 }
 0x63d   :  { %v1476_v50 = vpop.f32.mrb[19].mxu1  ;;  %2237 = vmatprep.subr.bf16.mxu0 %v2653_v1 }
 0x63f   :  { %2233 = vmatpush3.bf16.msra.mxu1 %v2232_v9 }
 0x640   :  { %2239 = vmatpush3.bf16.msra.mxu0 %v2238_v53 }
 0x641   :  { %2240 = vmatprep.subr.bf16.mxu0 %v2653_v1 }
 0x644   :  { %2242 = vmatpush3.bf16.msra.mxu0 %v2241_v34 }
 0x645   :  { %2243 = vmatprep.subr.bf16.mxu0 %v2653_v1 }
 0x648   :  { %2245 = vmatpush3.bf16.msra.mxu0 %v2244_v30 }
 0x649   :  { %2246 = vmatprep.subr.bf16.mxu0 %v2653_v1 }
 0x64c   :  { %2248 = vmatpush3.bf16.msra.mxu0 %v2247_v3 }
 0x64d   :  { %2249 = vmatprep.subr.bf16.mxu0 %v2653_v1 }
 0x650   :  { %2251 = vmatpush3.bf16.msra.mxu0 %v2250_v12 }
 0x651   :  { %2252 = vmatprep.subr.bf16.mxu0 %v2653_v1 }
 0x654   :  { %2254 = vmatpush3.bf16.msra.mxu0 %v2253_v60 }
 0x655   :  { %2255 = vmatprep.subr.bf16.mxu0 %v2653_v1  ;;  %v1890_v1 = vld [vmem:[#allocation20] ss:$0 sm:$0xff] }
 0x658   :  { %2257 = vmatpush3.bf16.msra.mxu0 %v2256_v48 }
 0x659   :  { %2165 = vmatprep.subr.mxu0 %v2655_v2 }
 0x70d   :  { %v1565_v22 = vpop.f32.mrb[20].mxu1 }
 0x70e   :  { %v1566_v7 = vadd.f32 %v1888_v17, %v1565_v22  ;;  %v2118_v55 = vpop.f32.mrb[21].mxu1 }
 0x710   :  { %v1569_v41 = vmax.f32 %v1566_v7, 0.0 }
 0x712   :  { %2128 = vmatmul.mubr.msk.f32.vlgmr.msra.gmra.mrb[22].mxu1 %vm642_vm8, %v1569_v41 }
 0x7e5   :  { %v1650_v32 = vpop.f32.mrb[22].mxu1 }
 0x7e6   :  { %v1651_v28 = vadd.f32 %v1890_v1, %v1650_v32  ;;  %v2129_v40 = vpop.f32.mrb[23].mxu1 }
 0x7e8   :  { %v1654_v59 = vmax.f32 %v1651_v28, 0.0 }
 0x7ea   :  { %2163 = vmatmul.mubr.f32.vlgmr.msra.gmra.mrb[22].mxu0 %v1654_v59 }
 0x7eb   :  { %2167 = vmatprep.mubr.msk.f32.mxu0 %vm2654_vm0, %v2655_v2  ;;  %v1757_v2 = vshrl.u32 %v1756_v25, 7 }
 0x7ed   :  { %v1758_v4 = vsub.s32 0, %v1757_v2 }
 0x7ef   :  { %v1759_v61 = vrot.slane %v1754_v54, %v1758_v4 }
 0x8bd   :  { %v1744_v56 = vpop.f32.mrb[22].mxu0 }
 0x8be   :  { %v1745_v62 = vadd.f32 %v1892_v58, %v1744_v56  ;;  %v2164_v36 = vpop.f32.mrb[23].mxu0 }
 0x8c0   :  { %v1748_v15 = vmax.f32 %v1745_v62, 0.0 }
 0x8c2   :  { %2166 = vmatpush3.xpose.msra.mxu0 %v1748_v15 }
 0x8c5   :  { %2168 = vmatmul.mubr.f32.vlgmr.msra.gmra.mrb[24].mxu0 %v1749_v47 }
 0x998   :  { %v1826_v5 = vpop.f32.mrb[24].mxu0 }
 0x999   :  { %v1827_v37 = vadd.f32 %v1826_v5, %v1759_v61  ;;  %v2169_v10 = vpop.f32.mrb[25].mxu0 }
 0x99b   :  { %1831 = vst.msk [vmem:[#allocation21] sm:$0x1] %vm1830_vm9, %v1827_v37 }
 0x99c   :  { %2615 = shalt.err (!%p2612_p8)
}
 0x99d   :  { %s2616_s2 = scalar_lea.hbm %s3674_s21, 16 }
 0x99e   :  { %p2617_p9 = scmp.ne.s32.totalorder %s3674_s21, %s2616_s2  ;;  %p2620_p10 = scmp.lt.u32.totalorder %s2616_s2, %s3674_s21 }
 0x9a0   :  { %p2622_p11 = pnand %p2620_p10, %p2617_p9 }
 0x9a2   :  { %2625 = shalt.err (!%p2622_p11)
}
 0x9a3   :  { %1841 = dma.vmem_to_hbm [thread:$0]  %s1839_s1, 16, %s3674_s21, [#allocation5]  }
 0x9a4   :  { %2638 = dma.done.wait [#allocation5], 16  }
 0x9a5   :  { %2639 = vsyncadd [#allocation5], 4294967280 }
 0x9a6   :  { %1845 = vsyncpa [#allocation4], 1 }
 0x9a7   :  { %1846 = vsyncpa [#allocation7], 1 }
 0x9a8   :  { %1847 = vsyncpa [#allocation10], 1 }
 0x9a9   :  { %1848 = vsyncpa [#allocation13], 1 }
 0x9aa   :  { %1849 = vsyncpa [#allocation16], 1 }
 0x9ab   :  { %1850 = vsyncpa [#allocation19], 1 }
 0x9ac   :  { %1851 = vsyncpa [#allocation5], 1 }

</bundles_post_ra>
